<compile_context>
chip_gen: v7x
topology: tpu7x:2x2x1
jax: 0.10.0
libtpu: 0.0.40
codegen_flags: <defaults>
</compile_context>

<pallas_src>
import functools

import jax
import jax.numpy as jnp
from jax.experimental import pallas as pl
from jax.experimental.pallas import tpu as pltpu

LRELU_SLOPE = 0.2
BN_EPS = 1e-5
LANE = 128
TARGET_M = 256          # target MXU M (rows) per grid step


# --------------------------- feature probes / helpers ------------------------

_BUFFERED_SINGLE = None
_VMEM_LIMIT = None
_IS_V5 = None


def _buffered_single_ok():
    """Probe whether this JAX build supports pl.Buffered(1) single-buffering."""
    global _BUFFERED_SINGLE
    if _BUFFERED_SINGLE is None:
        try:
            def _probe_kernel(x_ref, o_ref):
                o_ref[...] = x_ref[...] * 2.0

            spec = pl.BlockSpec((8, 128), lambda i: (0, 0),
                                pipeline_mode=pl.Buffered(1))
            r = pl.pallas_call(
                _probe_kernel,
                out_shape=jax.ShapeDtypeStruct((16, 128), jnp.float32),
                grid=(2,),
                in_specs=[spec],
                out_specs=pl.BlockSpec((8, 128), lambda i: (i, 0)),
            )(jnp.ones((8, 128), jnp.float32))
            jax.block_until_ready(r)
            _BUFFERED_SINGLE = True
        except Exception:
            _BUFFERED_SINGLE = False
    return _BUFFERED_SINGLE


def _const_spec(block_shape, index_map):
    """BlockSpec for operands whose block changes rarely across the grid:
    single-buffer them so a dead second VMEM copy is not kept around."""
    if _buffered_single_ok():
        return pl.BlockSpec(block_shape, index_map, pipeline_mode=pl.Buffered(1))
    return pl.BlockSpec(block_shape, index_map)


def _vmem_limit_bytes():
    """Explicit scoped-VMEM budget (3/4 of physical), per-generation safe."""
    global _VMEM_LIMIT
    if _VMEM_LIMIT is None:
        try:
            cap = pltpu.get_tpu_info().vmem_capacity_bytes
            _VMEM_LIMIT = int(cap * 3 // 4)
        except Exception:
            _VMEM_LIMIT = 32 * 1024 * 1024
    return _VMEM_LIMIT


def _is_v5e():
    global _IS_V5
    if _IS_V5 is None:
        try:
            kind = jax.devices()[0].device_kind.lower()
            _IS_V5 = "v5" in kind
        except Exception:
            _IS_V5 = False
    return _IS_V5


def _pick_toc(ocp):
    # v5e MXU is 4x128x128: N=256 buys nothing and doubles accumulator pressure.
    if ocp % 256 == 0 and not _is_v5e():
        return 256
    return 128


def _cost_estimate(flops, bytes_accessed):
    try:
        return pl.CostEstimate(flops=int(flops), transcendentals=0,
                               bytes_accessed=int(bytes_accessed))
    except Exception:
        return None


def _round_up(x, m):
    return ((x + m - 1) // m) * m


def _tile_plan(oh, ow):
    """Row-block tiling plan.  OW is padded to a multiple of 8 so the in-kernel
    (TOH, OWp, C) -> (TOH*OWp, C) reshape is a pure view and output stores are
    unmasked; TOH is chosen so M = TOH*OWp feeds the MXU with ~TARGET_M rows."""
    ow_pad = _round_up(ow, 8)
    toh = max(1, min(oh, -(-TARGET_M // ow_pad)))
    n_ohb = -(-oh // toh)
    return toh, n_ohb, toh * n_ohb, ow_pad


# ------------------------------ Pallas kernels --------------------------------

def _conv_kernel(z_ref, w_ref, b_ref, y_ref, *rest,
                 kh, kw, toh, ow_pad, oh_valid, ow_valid, bn, act, slope):
    """Direct stride-1 conv for one TOH-row block of one batch element / one OC tile.

    z_ref : (1, Zh, Zw, Cz) bf16 padded input slab (resident, single-buffered)
    w_ref : (kh, kw, Cz, TOC) bf16 ; b_ref: (1, TOC) f32
    y_ref : (1, TOH, OWp, TOC) bf16 output row block
    rest  : (psum, psq, acc) if bn else (acc,)
            psum/psq: (1, 1, 1, TOC) f32 per-block partial BN statistics
            acc     : VMEM (TOH*OWp, TOC) f32 accumulator scratch
    """
    acc_ref = rest[-1]
    ohb = pl.program_id(2)
    row0 = ohb * toh
    cz = z_ref.shape[3]

    first = True
    for i in range(kh):
        for j in range(kw):
            lhs = z_ref[0, pl.ds(row0 + i, toh), j:j + ow_pad, :]   # (TOH, OWp, Cz)
            lhs = lhs.reshape(toh * ow_pad, cz)                     # free: OWp % 8 == 0
            part = jnp.dot(lhs, w_ref[i, j], preferred_element_type=jnp.float32)
            if first:
                acc_ref[...] = part
                first = False
            else:
                acc_ref[...] += part

    toc = acc_ref.shape[1]
    res = acc_ref[...] + b_ref[...]                                 # (M, TOC) f32
    res3 = res.reshape(toh, ow_pad, toc)

    if bn:
        psum_ref, psq_ref = rest[0], rest[1]
        rid = jax.lax.broadcasted_iota(jnp.int32, (toh, ow_pad, 1), 0)
        cid = jax.lax.broadcasted_iota(jnp.int32, (toh, ow_pad, 1), 1)
        valid = ((row0 + rid) < oh_valid) & (cid < ow_valid)        # mask pad rows/cols
        rm = jnp.where(valid, res3, 0.0)
        psum_ref[0] = jnp.sum(rm, axis=(0, 1), keepdims=True)
        psq_ref[0] = jnp.sum(rm * res3, axis=(0, 1), keepdims=True)

    if act and not bn:   # LeakyReLU fused only when no BatchNorm follows the conv
        res3 = jnp.where(res3 >= 0, res3, res3 * slope)

    y_ref[0] = res3.astype(y_ref.dtype)


def _affine_lrelu_kernel(y_ref, sc_ref, sh_ref, o_ref, *, slope):
    """y * scale + shift, then LeakyReLU (BatchNorm normalize pass)."""
    v = y_ref[...].astype(jnp.float32) * sc_ref[...] + sh_ref[...]
    o_ref[...] = jnp.where(v >= 0, v, v * slope).astype(o_ref.dtype)


# ------------------------------ kernel wrappers --------------------------------

def conv_pallas(z, w, b, oh, ow, *, toh, n_ohb, ow_pad, kh, kw, act, bn,
                slope=LRELU_SLOPE):
    """Direct conv (stride 1, zero padding already folded into z).

    z: (N, Zh, Zw, Cz) bf16 with Zh >= n_ohb*toh + kh - 1, Zw >= ow_pad + kw - 1.
    Returns y (N, n_ohb*toh, ow_pad, OCp) bf16 (garbage beyond (oh, ow) rows/cols),
    plus per-block partial (sum, sumsq) of shape (N, n_ohb, 1, OCp) if bn=True.
    """
    n, zh, zw, cz = z.shape
    ocp = w.shape[3]
    toc = _pick_toc(ocp)
    n_oc = ocp // toc
    oh_pad = toh * n_ohb

    kernel = functools.partial(_conv_kernel, kh=kh, kw=kw, toh=toh, ow_pad=ow_pad,
                               oh_valid=oh, ow_valid=ow, bn=bn, act=act, slope=slope)

    # Grid order (nb, oc, ohb), ohb innermost: the heavy z slab is fetched once per
    # batch element and the weight tile stays resident across the full row sweep.
    grid = (n, n_oc, n_ohb)
    in_specs = [
        _const_spec((1, zh, zw, cz), lambda nb, oc, ohb: (nb, 0, 0, 0)),
        pl.BlockSpec((kh, kw, cz, toc), lambda nb, oc, ohb: (0, 0, 0, oc)),
        pl.BlockSpec((1, toc), lambda nb, oc, ohb: (0, oc)),
    ]
    y_shape = jax.ShapeDtypeStruct((n, oh_pad, ow_pad, ocp), jnp.bfloat16)
    y_spec = pl.BlockSpec((1, toh, ow_pad, toc), lambda nb, oc, ohb: (nb, ohb, 0, oc))
    scratch = [pltpu.VMEM((toh * ow_pad, toc), jnp.float32)]

    if bn:
        stat_shape = jax.ShapeDtypeStruct((n, n_ohb, 1, ocp), jnp.float32)
        stat_spec = pl.BlockSpec((1, 1, 1, toc), lambda nb, oc, ohb: (nb, ohb, 0, oc))
        out_shape = (y_shape, stat_shape, stat_shape)
        out_specs = (y_spec, stat_spec, stat_spec)
    else:
        out_shape = y_shape
        out_specs = y_spec

    flops = 2 * n * oh_pad * ow_pad * kh * kw * cz * ocp
    bytes_accessed = (z.size * 2                       # slab read once per batch elem
                      + n * w.size * 2                 # weights re-read once per nb
                      + n * b.size * 4
                      + n * oh_pad * ow_pad * ocp * 2  # y write
                      + (2 * n * n_ohb * ocp * 4 if bn else 0))

    return pl.pallas_call(
        kernel,
        out_shape=out_shape,
        grid=grid,
        in_specs=in_specs,
        out_specs=out_specs,
        scratch_shapes=scratch,
        compiler_params=pltpu.CompilerParams(
            dimension_semantics=("parallel", "parallel", "parallel"),
            vmem_limit_bytes=_vmem_limit_bytes()),
        cost_estimate=_cost_estimate(flops, bytes_accessed),
    )(z, w, b)


def affine_lrelu(y, scale, shift, *, toh, slope=LRELU_SLOPE):
    """Spatially tiled BatchNorm normalize + LeakyReLU."""
    n, oh_pad, ow_pad, c = y.shape
    n_ohb = oh_pad // toh
    sc = scale.reshape(1, 1, 1, c).astype(jnp.float32)
    sh = shift.reshape(1, 1, 1, c).astype(jnp.float32)
    return pl.pallas_call(
        functools.partial(_affine_lrelu_kernel, slope=slope),
        out_shape=jax.ShapeDtypeStruct((n, oh_pad, ow_pad, c), jnp.bfloat16),
        grid=(n, n_ohb),
        in_specs=[pl.BlockSpec((1, toh, ow_pad, c), lambda i, r: (i, r, 0, 0)),
                  _const_spec((1, 1, 1, c), lambda i, r: (0, 0, 0, 0)),
                  _const_spec((1, 1, 1, c), lambda i, r: (0, 0, 0, 0))],
        out_specs=pl.BlockSpec((1, toh, ow_pad, c), lambda i, r: (i, r, 0, 0)),
        compiler_params=pltpu.CompilerParams(
            dimension_semantics=("parallel", "parallel"),
            vmem_limit_bytes=_vmem_limit_bytes()),
    )(y, sc, sh)


# --------------------------------- JAX glue ------------------------------------

def _pad_s2d(x, zh_req, zw_req):
    """Zero-pad (2 on top/left, enough on bottom/right) and space-to-depth(2):
    4x4/stride-2 conv -> 2x2/stride-1 conv on a slab of exactly (zh_req, zw_req)."""
    n, h, w, c = x.shape
    hp, wp = 2 * zh_req, 2 * zw_req
    xp = jnp.pad(x, ((0, 0), (2, hp - 2 - h), (2, wp - 2 - w), (0, 0)))
    z = xp.reshape(n, zh_req, 2, zw_req, 2, c)
    z = z.transpose(0, 1, 3, 2, 4, 5).reshape(n, zh_req, zw_req, 4 * c)
    return z


def _pad_s1(x, zh_req, zw_req):
    """Zero-pad for the 4x4/stride-1 convs to a slab of exactly (zh_req, zw_req)."""
    n, h, w, _ = x.shape
    return jnp.pad(x, ((0, 0), (2, zh_req - 2 - h), (2, zw_req - 2 - w), (0, 0)))


def downsample_nhwc(x):
    """nn.AvgPool2d(3, stride=2, padding=1, count_include_pad=False) — XLA glue."""
    window, strides = (1, 3, 3, 1), (1, 2, 2, 1)
    padding = ((0, 0), (1, 1), (1, 1), (0, 0))
    sums = jax.lax.reduce_window(x, 0.0, jax.lax.add, window, strides, padding)
    ones = jnp.ones(x.shape[:3] + (1,), x.dtype)
    cnt = jax.lax.reduce_window(ones, 0.0, jax.lax.add, window, strides, padding)
    return sums / cnt


def nlayer_disc_forward(params, x_nhwc):
    """NLayerDiscriminator1 forward (getIntermFeat=False, use_sigmoid=False)."""
    h = x_nhwc
    for p in params:
        n, hgt, wid, _ = h.shape
        kh, kw = p['kh'], p['kw']
        if p['stride'] == 2:
            oh, ow = hgt // 2 + 1, wid // 2 + 1
        else:
            oh, ow = hgt + 1, wid + 1
        toh, n_ohb, oh_pad, ow_pad = _tile_plan(oh, ow)
        zh_req, zw_req = oh_pad + kh - 1, ow_pad + kw - 1

        if p['stride'] == 2:
            z = _pad_s2d(h, zh_req, zw_req)
        else:
            z = _pad_s1(h, zh_req, zw_req)

        if p['bn']:
            y, psum, psq = conv_pallas(z, p['w'], p['b'], oh, ow,
                                       toh=toh, n_ohb=n_ohb, ow_pad=ow_pad,
                                       kh=kh, kw=kw, act=False, bn=True)
            m = n * oh * ow
            ssum = jnp.sum(psum, axis=(0, 1, 2))                # (OCp,) f32
            ssq = jnp.sum(psq, axis=(0, 1, 2))
            mean = ssum / m
            var = jnp.maximum(ssq / m - mean * mean, 0.0)       # biased batch variance
            scale = p['gamma'][0] * jax.lax.rsqrt(var + BN_EPS)
            shift = p['beta'][0] - mean * scale
            y = affine_lrelu(y, scale, shift, toh=toh)
        else:
            y = conv_pallas(z, p['w'], p['b'], oh, ow,
                            toh=toh, n_ohb=n_ohb, ow_pad=ow_pad,
                            kh=kh, kw=kw, act=p['act'], bn=False)
        h = y[:, :oh, :ow, :]                                   # drop padded rows/cols
    return h


def multiscale_forward(all_params, test_image_nchw, cond_nchw, num_D):
    """MultiscaleDiscriminator.forward(test_image, cond)."""
    x = jnp.concatenate([cond_nchw, test_image_nchw], axis=1)   # cat on channel dim
    cur = jnp.transpose(x, (0, 2, 3, 1)).astype(jnp.float32)    # NCHW -> NHWC (f32 chain)
    results = []
    for i in range(num_D):
        params = all_params[num_D - 1 - i]                      # layer(num_D-1-i)
        out = nlayer_disc_forward(params, cur.astype(jnp.bfloat16))
        out = out[..., :params[-1]['oc_real']]                  # drop zero-padded channels
        results.append([jnp.transpose(out, (0, 3, 1, 2)).astype(jnp.float32)])
        if i != num_D - 1:
            cur = downsample_nhwc(cur)
    return results


# ----------------------------- parameter creation -------------------------------

def init_disc_params(key, input_nc, ndf, n_layers):
    """Deterministic synthetic params for one NLayerDiscriminator1, prepared for the
    Pallas kernels (bf16 weights, channel padding to 128, s2d-folded stride-2 weights)."""
    cfg = [(input_nc, ndf, 2, False, True)]                     # (ic, oc, stride, bn, act)
    nf = ndf
    for _ in range(1, n_layers):
        nf_prev, nf = nf, min(nf * 2, 512)
        cfg.append((nf_prev, nf, 2, True, True))
    nf_prev, nf = nf, min(nf * 2, 512)
    cfg.append((nf_prev, nf, 1, True, True))
    cfg.append((nf, 1, 1, False, False))

    params = []
    prev_oc_pad = None
    for li, (ic, oc, stride, bn, act) in enumerate(cfg):
        key, k1, k2, k3, k4 = jax.random.split(key, 5)
        w = jax.random.normal(k1, (oc, ic, 4, 4), jnp.float32) * 0.02   # PyTorch OIHW
        b = jax.random.normal(k2, (oc,), jnp.float32) * 0.01

        ic_pad = ic if li == 0 else prev_oc_pad
        oc_pad = _round_up(oc, LANE)

        # (kh, kw, ic, oc), zero-padded channels (lane-dense MXU tiles).
        w_t = jnp.transpose(w, (2, 3, 1, 0))
        w_t = jnp.pad(w_t, ((0, 0), (0, 0), (0, ic_pad - ic), (0, oc_pad - oc)))
        if stride == 2:
            # fold the space-to-depth applied to the input: 4x4/s2 -> 2x2/s1, 4*ic channels
            w_t = w_t.reshape(2, 2, 2, 2, ic_pad, oc_pad).transpose(0, 2, 1, 3, 4, 5)
            w_t = w_t.reshape(2, 2, 4 * ic_pad, oc_pad)
            kh = kw = 2
        else:
            kh = kw = 4

        b_p = jnp.pad(b, (0, oc_pad - oc)).reshape(1, oc_pad)
        p = dict(w=w_t.astype(jnp.bfloat16), b=b_p.astype(jnp.float32),
                 stride=stride, bn=bn, act=act, kh=kh, kw=kw,
                 oc_real=oc, oc_pad=oc_pad)
        if bn:
            gamma = 1.0 + 0.1 * jax.random.normal(k3, (oc,), jnp.float32)
            beta = 0.1 * jax.random.normal(k4, (oc,), jnp.float32)
            p['gamma'] = jnp.pad(gamma, (0, oc_pad - oc)).reshape(1, oc_pad)
            p['beta'] = jnp.pad(beta, (0, oc_pad - oc)).reshape(1, oc_pad)
        prev_oc_pad = oc_pad
        params.append(p)
    return params, key


# ------------------------------------ main ---------------------------------------

if __name__ == "__main__":
    # Small config: test_image (2, 2, 16, 16), cond (2, 2, 16, 16) -> input_nc = 4
    batch, c_img, c_cond, spatial = 2, 2, 2, 16
    input_nc = c_img + c_cond
    ndf, n_layers, num_D = 8, 3, 3

    key = jax.random.PRNGKey(0)
    all_params = []
    for _ in range(num_D):
        p, key = init_disc_params(key, input_nc, ndf, n_layers)
        all_params.append(p)

    key, k_img, k_cond = jax.random.split(key, 3)
    test_image = jax.random.normal(k_img, (batch, c_img, spatial, spatial), jnp.float32)
    cond = jax.random.normal(k_cond, (batch, c_cond, spatial, spatial), jnp.float32)

    results = multiscale_forward(all_params, test_image, cond, num_D)
    jax.block_until_ready(results)
    # results: list (len num_D) of [output], outputs NCHW, e.g. (2,1,5,5), (2,1,4,4), (2,1,4,4)
    print("KERNEL_OK")
</pallas_src>

<mosaic_0001>
module attributes {stable_mosaic.version = 11 : i64} {
  func.func @_probe_kernel(%arg0: i32, %arg1: memref<8x128xf32, #tpu.memory_space<vmem>>, %arg2: memref<8x128xf32, #tpu.memory_space<vmem>>) attributes {dimension_semantics = [#tpu.dimension_semantics<arbitrary>], iteration_bounds = array<i64: 2>, scalar_prefetch = 0 : i64, scratch_operands = 0 : i64, tpu.core_type = #tpu.core_type<tc>, window_params = [{pipeline_mode = #tpu.pipeline_mode<synchronous>, transform_indices = @transform_0, window_bounds = array<i64: 8, 128>}, {transform_indices = @transform_1, window_bounds = array<i64: 8, 128>}]} {
    %c0 = arith.constant 0 : index
    %c0_0 = arith.constant 0 : index
    %0 = vector.load %arg1[%c0, %c0_0] : memref<8x128xf32, #tpu.memory_space<vmem>>, vector<8x128xf32>
    %cst = arith.constant 2.000000e+00 : f32
    %1 = vector.broadcast %cst : f32 to vector<8x128xf32>
    %2 = arith.mulf %0, %1 : vector<8x128xf32>
    %c0_1 = arith.constant 0 : index
    %c0_2 = arith.constant 0 : index
    %3 = vector.load %arg2[%c0_1, %c0_2] : memref<8x128xf32, #tpu.memory_space<vmem>>, vector<8x128xf32>
    tpu.vector_store %arg2[%c0_1, %c0_2], %2 {strides = array<i32>} : memref<8x128xf32, #tpu.memory_space<vmem>>, vector<8x128xf32>,
    return
  }
  func.func @transform_0(%arg0: i32) -> (i32, i32) {
    %c0_i32 = arith.constant 0 : i32
    %c0_i32_0 = arith.constant 0 : i32
    %c0_i32_1 = arith.constant 0 : i32
    return %c0_i32, %c0_i32_0 : i32, i32
  }
  func.func @transform_1(%arg0: i32) -> (i32, i32) {
    %c0_i32 = arith.constant 0 : i32
    %c0_i32_0 = arith.constant 0 : i32
    return %arg0, %c0_i32 : i32, i32
  }
}

module attributes {stable_mosaic.version = 11 : i64} {
  func.func @_conv_kernel(%arg0: i32, %arg1: i32, %arg2: i32, %arg3: memref<1x10x17x16xbf16, #tpu.memory_space<vmem>>, %arg4: memref<2x2x16x128xbf16, #tpu.memory_space<vmem>>, %arg5: memref<1x128xf32, #tpu.memory_space<vmem>>, %arg6: memref<1x9x16x128xbf16, #tpu.memory_space<vmem>>, %arg7: memref<144x128xf32, #tpu.memory_space<vmem>>) attributes {dimension_semantics = [#tpu.dimension_semantics<parallel>, #tpu.dimension_semantics<parallel>, #tpu.dimension_semantics<parallel>], iteration_bounds = array<i64: 2, 1, 1>, scalar_prefetch = 0 : i64, scratch_operands = 1 : i64, tpu.core_type = #tpu.core_type<tc>, window_params = [{transform_indices = @transform_0, window_bounds = array<i64: 1, 10, 17, 16>}, {transform_indices = @transform_1, window_bounds = array<i64: 2, 2, 16, 128>}, {transform_indices = @transform_2, window_bounds = array<i64: 1, 128>}, {transform_indices = @transform_3, window_bounds = array<i64: 1, 9, 16, 128>}]} {
    %c9_i32 = arith.constant 9 : i32
    %0 = arith.muli %arg2, %c9_i32 : i32
    %c0_i32 = arith.constant 0 : i32
    %1 = arith.addi %0, %c0_i32 : i32
    %c0 = arith.constant 0 : index
    %2 = arith.index_cast %1 : i32 to index
    %c0_0 = arith.constant 0 : index
    %c0_1 = arith.constant 0 : index
    %3 = vector.load %arg3[%c0, %2, %c0_0, %c0_1] : memref<1x10x17x16xbf16, #tpu.memory_space<vmem>>, vector<1x9x16x16xbf16>
    %4 = vector.shape_cast %3 : vector<1x9x16x16xbf16> to vector<9x16x16xbf16>
    %5 = vector.shape_cast %4 : vector<9x16x16xbf16> to vector<144x16xbf16>
    %c0_2 = arith.constant 0 : index
    %c0_3 = arith.constant 0 : index
    %c0_4 = arith.constant 0 : index
    %c0_5 = arith.constant 0 : index
    %6 = vector.load %arg4[%c0_2, %c0_3, %c0_4, %c0_5] : memref<2x2x16x128xbf16, #tpu.memory_space<vmem>>, vector<1x1x16x128xbf16>
    %7 = vector.shape_cast %6 : vector<1x1x16x128xbf16> to vector<16x128xbf16>
    %cst = arith.constant dense<0.000000e+00> : vector<144x128xf32>
    %8 = tpu.matmul %5, %7, %cst {dimension_numbers = #tpu.dot_dimension_numbers<[1], [0], [0], [1], [0, 0, 1, 1], [], []>} : vector<144x16xbf16>, vector<16x128xbf16>, vector<144x128xf32> -> vector<144x128xf32>
    %c0_6 = arith.constant 0 : index
    %c0_7 = arith.constant 0 : index
    %9 = vector.load %arg7[%c0_6, %c0_7] : memref<144x128xf32, #tpu.memory_space<vmem>>, vector<144x128xf32>
    tpu.vector_store %arg7[%c0_6, %c0_7], %8 {strides = array<i32>} : memref<144x128xf32, #tpu.memory_space<vmem>>, vector<144x128xf32>,
    %c0_i32_8 = arith.constant 0 : i32
    %10 = arith.addi %0, %c0_i32_8 : i32
    %c0_9 = arith.constant 0 : index
    %11 = arith.index_cast %10 : i32 to index
    %c1 = arith.constant 1 : index
    %c0_10 = arith.constant 0 : index
    %12 = vector.load %arg3[%c0_9, %11, %c1, %c0_10] : memref<1x10x17x16xbf16, #tpu.memory_space<vmem>>, vector<1x9x16x16xbf16>
    %13 = vector.shape_cast %12 : vector<1x9x16x16xbf16> to vector<9x16x16xbf16>
    %14 = vector.shape_cast %13 : vector<9x16x16xbf16> to vector<144x16xbf16>
    %c0_11 = arith.constant 0 : index
    %c1_12 = arith.constant 1 : index
    %c0_13 = arith.constant 0 : index
    %c0_14 = arith.constant 0 : index
    %15 = vector.load %arg4[%c0_11, %c1_12, %c0_13, %c0_14] : memref<2x2x16x128xbf16, #tpu.memory_space<vmem>>, vector<1x1x16x128xbf16>
    %16 = vector.shape_cast %15 : vector<1x1x16x128xbf16> to vector<16x128xbf16>
    %cst_15 = arith.constant dense<0.000000e+00> : vector<144x128xf32>
    %17 = tpu.matmul %14, %16, %cst_15 {dimension_numbers = #tpu.dot_dimension_numbers<[1], [0], [0], [1], [0, 0, 1, 1], [], []>} : vector<144x16xbf16>, vector<16x128xbf16>, vector<144x128xf32> -> vector<144x128xf32>
    %c0_16 = arith.constant 0 : index
    %c0_17 = arith.constant 0 : index
    %18 = vector.load %arg7[%c0_16, %c0_17] : memref<144x128xf32, #tpu.memory_space<vmem>>, vector<144x128xf32>
    %19 = arith.addf %18, %17 : vector<144x128xf32>
    %c0_18 = arith.constant 0 : index
    %c0_19 = arith.constant 0 : index
    %20 = vector.load %arg7[%c0_18, %c0_19] : memref<144x128xf32, #tpu.memory_space<vmem>>, vector<144x128xf32>
    tpu.vector_store %arg7[%c0_18, %c0_19], %19 {strides = array<i32>} : memref<144x128xf32, #tpu.memory_space<vmem>>, vector<144x128xf32>,
    %c1_i32 = arith.constant 1 : i32
    %21 = arith.addi %0, %c1_i32 : i32
    %c0_20 = arith.constant 0 : index
    %22 = arith.index_cast %21 : i32 to index
    %c0_21 = arith.constant 0 : index
    %c0_22 = arith.constant 0 : index
    %23 = vector.load %arg3[%c0_20, %22, %c0_21, %c0_22] : memref<1x10x17x16xbf16, #tpu.memory_space<vmem>>, vector<1x9x16x16xbf16>
    %24 = vector.shape_cast %23 : vector<1x9x16x16xbf16> to vector<9x16x16xbf16>
    %25 = vector.shape_cast %24 : vector<9x16x16xbf16> to vector<144x16xbf16>
    %c1_23 = arith.constant 1 : index
    %c0_24 = arith.constant 0 : index
    %c0_25 = arith.constant 0 : index
    %c0_26 = arith.constant 0 : index
    %26 = vector.load %arg4[%c1_23, %c0_24, %c0_25, %c0_26] : memref<2x2x16x128xbf16, #tpu.memory_space<vmem>>, vector<1x1x16x128xbf16>
    %27 = vector.shape_cast %26 : vector<1x1x16x128xbf16> to vector<16x128xbf16>
    %cst_27 = arith.constant dense<0.000000e+00> : vector<144x128xf32>
    %28 = tpu.matmul %25, %27, %cst_27 {dimension_numbers = #tpu.dot_dimension_numbers<[1], [0], [0], [1], [0, 0, 1, 1], [], []>} : vector<144x16xbf16>, vector<16x128xbf16>, vector<144x128xf32> -> vector<144x128xf32>
    %c0_28 = arith.constant 0 : index
    %c0_29 = arith.constant 0 : index
    %29 = vector.load %arg7[%c0_28, %c0_29] : memref<144x128xf32, #tpu.memory_space<vmem>>, vector<144x128xf32>
    %30 = arith.addf %29, %28 : vector<144x128xf32>
    %c0_30 = arith.constant 0 : index
    %c0_31 = arith.constant 0 : index
    %31 = vector.load %arg7[%c0_30, %c0_31] : memref<144x128xf32, #tpu.memory_space<vmem>>, vector<144x128xf32>
    tpu.vector_store %arg7[%c0_30, %c0_31], %30 {strides = array<i32>} : memref<144x128xf32, #tpu.memory_space<vmem>>, vector<144x128xf32>,
    %c1_i32_32 = arith.constant 1 : i32
    %32 = arith.addi %0, %c1_i32_32 : i32
    %c0_33 = arith.constant 0 : index
    %33 = arith.index_cast %32 : i32 to index
    %c1_34 = arith.constant 1 : index
    %c0_35 = arith.constant 0 : index
    %34 = vector.load %arg3[%c0_33, %33, %c1_34, %c0_35] : memref<1x10x17x16xbf16, #tpu.memory_space<vmem>>, vector<1x9x16x16xbf16>
    %35 = vector.shape_cast %34 : vector<1x9x16x16xbf16> to vector<9x16x16xbf16>
    %36 = vector.shape_cast %35 : vector<9x16x16xbf16> to vector<144x16xbf16>
    %c1_36 = arith.constant 1 : index
    %c1_37 = arith.constant 1 : index
    %c0_38 = arith.constant 0 : index
    %c0_39 = arith.constant 0 : index
    %37 = vector.load %arg4[%c1_36, %c1_37, %c0_38, %c0_39] : memref<2x2x16x128xbf16, #tpu.memory_space<vmem>>, vector<1x1x16x128xbf16>
    %38 = vector.shape_cast %37 : vector<1x1x16x128xbf16> to vector<16x128xbf16>
    %cst_40 = arith.constant dense<0.000000e+00> : vector<144x128xf32>
    %39 = tpu.matmul %36, %38, %cst_40 {dimension_numbers = #tpu.dot_dimension_numbers<[1], [0], [0], [1], [0, 0, 1, 1], [], []>} : vector<144x16xbf16>, vector<16x128xbf16>, vector<144x128xf32> -> vector<144x128xf32>
    %c0_41 = arith.constant 0 : index
    %c0_42 = arith.constant 0 : index
    %40 = vector.load %arg7[%c0_41, %c0_42] : memref<144x128xf32, #tpu.memory_space<vmem>>, vector<144x128xf32>
    %41 = arith.addf %40, %39 : vector<144x128xf32>
    %c0_43 = arith.constant 0 : index
    %c0_44 = arith.constant 0 : index
    %42 = vector.load %arg7[%c0_43, %c0_44] : memref<144x128xf32, #tpu.memory_space<vmem>>, vector<144x128xf32>
    tpu.vector_store %arg7[%c0_43, %c0_44], %41 {strides = array<i32>} : memref<144x128xf32, #tpu.memory_space<vmem>>, vector<144x128xf32>,
    %c0_45 = arith.constant 0 : index
    %c0_46 = arith.constant 0 : index
    %43 = vector.load %arg7[%c0_45, %c0_46] : memref<144x128xf32, #tpu.memory_space<vmem>>, vector<144x128xf32>
    %c0_47 = arith.constant 0 : index
    %c0_48 = arith.constant 0 : index
    %44 = vector.load %arg5[%c0_47, %c0_48] : memref<1x128xf32, #tpu.memory_space<vmem>>, vector<1x128xf32>
    %45 = vector.broadcast %44 : vector<1x128xf32> to vector<144x128xf32>
    %46 = arith.addf %43, %45 : vector<144x128xf32>
    %47 = vector.shape_cast %46 : vector<144x128xf32> to vector<9x16x128xf32>
    %cst_49 = arith.constant 0.000000e+00 : f32
    %48 = vector.broadcast %cst_49 : f32 to vector<9x16x128xf32>
    %49 = arith.cmpf oge, %47, %48 : vector<9x16x128xf32>
    %cst_50 = arith.constant 2.000000e-01 : f32
    %50 = vector.broadcast %cst_50 : f32 to vector<9x16x128xf32>
    %51 = arith.mulf %47, %50 : vector<9x16x128xf32>
    %52 = arith.select %49, %47, %51 : vector<9x16x128xi1>, vector<9x16x128xf32>
    %53 = arith.truncf %52 : vector<9x16x128xf32> to vector<9x16x128xbf16>
    %c0_51 = arith.constant 0 : index
    %c0_52 = arith.constant 0 : index
    %c0_53 = arith.constant 0 : index
    %c0_54 = arith.constant 0 : index
    %54 = vector.load %arg6[%c0_51, %c0_52, %c0_53, %c0_54] : memref<1x9x16x128xbf16, #tpu.memory_space<vmem>>, vector<1x9x16x128xbf16>
    %55 = vector.shape_cast %54 : vector<1x9x16x128xbf16> to vector<9x16x128xbf16>
    %56 = vector.shape_cast %53 : vector<9x16x128xbf16> to vector<1x9x16x128xbf16>
    tpu.vector_store %arg6[%c0_51, %c0_52, %c0_53, %c0_54], %56 {strides = array<i32>} : memref<1x9x16x128xbf16, #tpu.memory_space<vmem>>, vector<1x9x16x128xbf16>,
    return
  }
  func.func @transform_0(%arg0: i32, %arg1: i32, %arg2: i32) -> (i32, i32, i32, i32) {
    %c0_i32 = arith.constant 0 : i32
    %c0_i32_0 = arith.constant 0 : i32
    %c0_i32_1 = arith.constant 0 : i32
    %c0_i32_2 = arith.constant 0 : i32
    return %arg0, %c0_i32, %c0_i32_0, %c0_i32_1 : i32, i32, i32, i32
  }
  func.func @transform_1(%arg0: i32, %arg1: i32, %arg2: i32) -> (i32, i32, i32, i32) {
    %c0_i32 = arith.constant 0 : i32
    %c0_i32_0 = arith.constant 0 : i32
    %c0_i32_1 = arith.constant 0 : i32
    %c0_i32_2 = arith.constant 0 : i32
    return %c0_i32, %c0_i32_0, %c0_i32_1, %arg1 : i32, i32, i32, i32
  }
  func.func @transform_2(%arg0: i32, %arg1: i32, %arg2: i32) -> (i32, i32) {
    %c0_i32 = arith.constant 0 : i32
    %c0_i32_0 = arith.constant 0 : i32
    return %c0_i32, %arg1 : i32, i32
  }
  func.func @transform_3(%arg0: i32, %arg1: i32, %arg2: i32) -> (i32, i32, i32, i32) {
    %c0_i32 = arith.constant 0 : i32
    %c0_i32_0 = arith.constant 0 : i32
    return %arg0, %arg2, %c0_i32, %arg1 : i32, i32, i32, i32
  }
}

</mosaic_0001>

<bundles_post_ra>
// kernel: tpu_custom_call.1
= control target key start
LH: loop header
LB: loop body
LE: loop exit
PB: predicated region body
PF: predicated region fallthrough
CT: control target
= control target key end

     0   :  { %6 = vsyncpa [#allocation3], 0  ;;  %s482_s0 = inlined_call_operand.hbm [shape: f32[8,128], index: 0, kind: input, shape index: {}]   ;;  %s483_s1 = inlined_call_operand.hbm [shape: f32[16,128], index: 1, kind: output, shape index: {}]  }
   0x1   :  { %7 = vsyncpa [#allocation4], 0 }
   0x2   :  { %9 = vsyncpa [#allocation4 + $0x1], 0  ;;  %s352_s6 = smov 0   ;;  %s354_s7 = smov 0  }
   0x3   :  { %s356_s8 = smov 0   ;;  %s358_s9 = smov 0  }
   0x4 LB: > { %s373_s10 = sadd.s32 4294967295, %s338_s9   ;;  %s184_s11 = sadd.s32 4294967294, %s338_s9   ;;  %s338_s9 = sphi %s358_s9, %s499_s9   ;;  %s334_s8 = sphi %s356_s8, %s498_s8   ;;  %s330_s7 = sphi %s354_s7, %s497_s7   ;;  %s326_s6 = sphi %s352_s6, %s496_s6  }
   0x5   : > { %s377_s12 = sadd.s32 1, %s338_s9   ;;  %s43_s13 = sadd.s32 1, %s334_s8 }
   0x6   : > { %s40_s14 = ssub.s32 %s338_s9, %s377_s12  ;;  %p53_p0 = scmp.ne.s32.totalorder %s334_s8, %s330_s7 }
   0x7   : > { %p41_p1 = scmp.eq.s32.totalorder %s40_s14, 0  ;;  %p54_p2 = scmp.eq.s32.totalorder %s373_s10, 1 }
   0x8   : > { %p59_p3 = scmp.ne.s32.totalorder %s330_s7, %s326_s6  ;;  %p60_p4 = scmp.eq.s32.totalorder %s184_s11, 1 }
   0x9   : > { %s388_s15 = scalar_select %p41_p1, %s334_s8, %s43_s13  }
   0xa   : > { %p390_p5 = por %p54_p2, %p53_p0  ;;  %p394_p6 = por %p60_p4, %p59_p3 }
   0xb   : > { %p185_p7 = scmp.ge.s32.totalorder %s338_s9, 1  ;;  %p67_p8 = scmp.lt.s32.totalorder %s338_s9, 3 }
   0xc   : > { %s487_s16 = scalar_select %p390_p5, 1, 0 }
   0xd   : > { %s488_s17 = scalar_select %p394_p6, 1, 0 }
   0xe   : > { %p484_p9 = scmp.eq.s32.totalorder %s373_s10, 0  ;;  %p401_p10 = pnand %p185_p7, %p67_p8 }
   0xf   : > { %s340_s19 = smov [#allocation2]   ;;  %s244_s24 = scalar_lea.hbm %s482_s0, 128 }
  0x10   : > { %s489_s18 = scalar_select %p401_p10, 1, 0 }
  0x11   : > { %s80_s20 = sshll.u32 %s340_s19, 4  ;;  %p200_p11 = pneg %p401_p10  ;;  %s81_s20 = int_to_ptr.vmem [resolvable:$true] %s80_s20 }
  0x12   : > { %p245_p13 = scmp.ne.s32.totalorder %s482_s0, %s244_s24  ;;  %p251_p3 = scmp.lt.u32.totalorder %s244_s24, %s482_s0 }
  0x13   : > { %p409_p12 = pnand %p484_p9, %p200_p11 }
  0x15   : > { %p246_p0 = pneg %p409_p12 }
  0x17   : > { %p247_p1 = pnand %p246_p0, %p245_p13 }
  0x19   : > { %p248_p2 = pneg %p247_p1 }
  0x1b   : > { %p253_p4 = pnand %p251_p3, %p248_p2 }
  0x1d   : > { %256 = shalt.err (!%p253_p4)
}
  0x1e   : > { %s257_s29 = scalar_lea.vmem %s81_s20, 128  ;;  %p265_p9 = scmp.lt.s32.totalorder %s81_s20, %s81_s20 }
  0x1f   : > { %p258_p7 = scmp.ne.s32.totalorder %s81_s20, %s257_s29  ;;  %p266_p6 = scmp.lt.s32.totalorder %s257_s29, %s257_s29 }
  0x21   : > { %p260_p8 = pnand %p258_p7, %p246_p0  ;;  %p267_p5 = por %p266_p6, %p265_p9 }
  0x23   : > { %p261_p11 = pneg %p260_p8 }
  0x25   : > { %p268_p10 = pnand %p267_p5, %p261_p11 }
  0x27   : > { %271 = shalt.err (!%p268_p10)
}
  0x28   : > { %203 = dma.hbm_to_vmem [thread:$0]  (!%p409_p12), %s482_s0, 128, %s81_s20, [#allocation3]  }
  0x29   : > { %p491_p13 = scmp.ne.s32.totalorder %s489_s18, 0 }
  0x2a   : > { %p492_p1 = scmp.eq.s32.totalorder (!%p491_p13), %s373_s10, 0 }
  0x2b   : > { %93 = sbr.rel (%p491_p13) target bundleno = 77 (0x4d), region = 24 }
  0x32   : > { %317 = dma.done.wait (%p492_p1), [#allocation3], 128   ;;  %p493_p0 = pmov %p492_p1 }
  0x33   : > { %s105_s3 = sand.u32 1, %s330_s7   ;;  %s191_s13 = sshll.u32 %s373_s10, 7  ;;  %v108_v0 = vld [vmem:[#allocation2] sm:$0xff] }
  0x34   : > { %319 = vsyncadd (%p493_p0), [#allocation3], 4294967168  ;;  %s189_s4 = sshll.u32 %s105_s3, 3  ;;  %v109_v1 = vmul.f32 2.0, %v108_v0  ;;  %s442_s19 = scalar_lea.hbm %s483_s1, %s191_s13 }
  0x35   : > { %s107_s5 = scalar_lea.vmem [#allocation5], %s189_s4  ;;  %s112_s20 = scalar_lea.sflag [#allocation4], %s105_s3 }
  0x36   : > { %s125_s11 = sshll.u32 %s107_s5, 4  ;;  %110 = vst [vmem:[%s107_s5] sm:$0xff] %v109_v1  ;;  %p494_p6 = scmp.ne.s32.totalorder %s487_s16, 0  ;;  %s437_s11 = int_to_ptr.vmem [resolvable:$true] %s125_s11 }
  0x37   : > { %s272_s21 = scalar_lea.vmem %s437_s11, 128  ;;  %s341_s10 = smov [#allocation5]  }
  0x38   : > { %p273_p5 = scmp.ne.s32.totalorder %s437_s11, %s272_s21  ;;  %s276_s22 = sshll.u32 %s341_s10, 4  ;;  %s277_s22 = int_to_ptr.vmem [resolvable:$false] %s276_s22 }
  0x39   : > { %s278_s23 = scalar_lea.vmem %s277_s22, 256  ;;  %p279_p12 = scmp.lt.s32.totalorder %s437_s11, %s277_s22 }
  0x3a   : > { %p274_p9 = pnand %p273_p5, %p494_p6  ;;  %p280_p2 = scmp.lt.s32.totalorder %s278_s23, %s272_s21 }
  0x3c   : > { %p275_p10 = pneg %p274_p9  ;;  %p281_p3 = por %p280_p2, %p279_p12 }
  0x3e   : > { %p282_p4 = pnand %p281_p3, %p275_p10 }
  0x40   : > { %285 = shalt.err (!%p282_p4)
}
  0x41   : > { %s286_s24 = scalar_lea.hbm %s442_s19, 128  ;;  %s290_s27 = scalar_lea.hbm %s483_s1, 256 }
  0x42   : > { %p287_p7 = scmp.ne.s32.totalorder %s442_s19, %s286_s24  ;;  %p291_p13 = scmp.lt.u32.totalorder %s442_s19, %s483_s1 }
  0x43   : > { %p292_p1 = scmp.lt.u32.totalorder %s290_s27, %s286_s24  ;;  %p294_p5 = scmp.lt.u32.totalorder %s286_s24, %s442_s19 }
  0x44   : > { %p288_p8 = pnand %p287_p7, %p494_p6 }
  0x45   : > { %p293_p0 = por %p292_p1, %p291_p13 }
  0x46   : > { %p289_p11 = pneg %p288_p8 }
  0x47   : > { %p295_p9 = por %p294_p5, %p293_p0 }
  0x49   : > { %p296_p10 = pnand %p295_p9, %p289_p11 }
  0x4b   : > { %299 = shalt.err (!%p296_p10)
}
  0x4c   : > { %198 = dma.vmem_to_hbm [thread:$0]  (%p494_p6), %s437_s11, 128, %s442_s19, %s112_s20  }
  0x4d PF: > { %p210_p12 = scmp.ge.s32.totalorder %s338_s9, 2  ;;  %s137_s30 = sand.u32 1, %s326_s6  }
  0x4e   : > { %p495_p2 = scmp.ne.s32.totalorder %s488_s17, 0  ;;  %s138_s2 = scalar_lea.sflag [#allocation4], %s137_s30 }
  0x50   : > { %p205_p3 = pnand %p210_p12, %p495_p2 }
  0x52   : > { %321 = dma.done.wait (!%p205_p3), %s138_s2, 128  }
  0x53   : > { %323 = vsyncadd (!%p205_p3), %s138_s2, 4294967168  ;;  %p12_p4 = scmp.ge.s32.totalorder %s377_s12, 4   ;;  %s496_s6 = smov %s330_s7 }
  0x54   : > { %s497_s7 = smov %s334_s8  ;;  %s498_s8 = smov %s388_s15 }
  0x55   : > { %s499_s9 = smov %s377_s12  ;;  %14 = sbr.rel (!%p12_p4) target bundleno = 4 (0x4), region = 61 }
  0x5c   :  { %143 = vsyncpa [#allocation3], 1 }
  0x5d   :  { %145 = vsyncpa [#allocation3 + $0x1], 1 }
  0x5e   :  { %146 = vsyncpa [#allocation4], 1 }
  0x5f   :  { %148 = vsyncpa [#allocation4 + $0x1], 1 }

// kernel: tpu_custom_call.1
= control target key start
LH: loop header
LB: loop body
LE: loop exit
PB: predicated region body
PF: predicated region fallthrough
CT: control target
= control target key end

     0   :  { %8 = vsyncpa [#allocation4], 0  ;;  %s3054_s0 = inlined_call_operand.vmem [shape: bf16[2,10,17,16], index: 0, kind: input, shape index: {}]   ;;  %s3055_s1 = inlined_call_operand.vmem [shape: bf16[2,2,16,128], index: 1, kind: input, shape index: {}]   ;;  %s3056_s2 = inlined_call_operand.vmem [shape: f32[1,128], index: 2, kind: input, shape index: {}]   ;;  %s3057_s3 = inlined_call_operand.hbm [shape: bf16[2,9,16,128], index: 3, kind: output, shape index: {}]  }
   0x1   :  { %10 = vsyncpa [#allocation4 + $0x1], 0  ;;  %s2570_s12 = smov 0   ;;  %s2572_s13 = smov 0  }
   0x2   :  { %s2574_s14 = smov 0   ;;  %s2576_s15 = smov 0  }
   0x3   :  { %s2578_s16 = smov 0   ;;  %s2580_s17 = smov 0  }
   0x4 LB: > { %s1961_s18 = sadd.s32 4294967295, %s2543_s17   ;;  %s1962_s19 = sadd.s32 4294967294, %s2543_s17   ;;  %s2543_s17 = sphi %s2580_s17, %s16_s17   ;;  %s2539_s16 = sphi %s2578_s16, %s3066_s16   ;;  %s2535_s15 = sphi %s2576_s15, %s3065_s15   ;;  %s2531_s14 = sphi %s2574_s14, %s3064_s14   ;;  %s2527_s13 = sphi %s2572_s13, %s3063_s13   ;;  %s2523_s12 = sphi %s2570_s12, %s3062_s12  }
   0x5   : > { %s35_s20 = sadd.s32 1, %s2539_s16  ;;  %s124_s21 = sadd.s32 1, %s2531_s14 }
   0x6   : > { %p37_p0 = scmp.ge.s32.totalorder %s35_s20, 2  ;;  %p134_p1 = scmp.ne.s32.totalorder %s2531_s14, %s2527_s13 }
   0x7   : > { %p135_p2 = scmp.eq.s32.totalorder %s1961_s18, 1  ;;  %p140_p3 = scmp.ne.s32.totalorder %s2527_s13, %s2523_s12 }
   0x8   : > { %s3068_s20 = smov (%p37_p0, %s35_s20), 0  ;;  %p141_p5 = scmp.eq.s32.totalorder %s1962_s19, 1 }
   0x9   : > { %p2610_p4 = por %p135_p2, %p134_p1  ;;  %s117_s23 = ssub.s32 %s2539_s16, %s3068_s20 }
   0xa   : > { %p1967_p6 = scmp.ge.s32.totalorder %s2543_s17, 1  ;;  %p122_p7 = scmp.eq.s32.totalorder %s117_s23, 0 }
   0xb   : > { %p2617_p8 = por %p141_p5, %p140_p3  ;;  %p180_p9 = scmp.lt.s32.totalorder %s2543_s17, 3 }
   0xc   : > { %s2623_s25 = scalar_select %p122_p7, %s2531_s14, %s124_s21  }
   0xd   : > { %p181_p10 = pnand %p1967_p6, %p180_p9 }
   0xe   : > { %v2443_v0 = vld [vmem:[%s3055_s1] sm:$0xff] (!%p181_p10)   ;;  %v2545_v1 = vmov (!%p181_p10), 0.0   ;;  %p211_p11 = scmp.lt.s32.totalorder (!%p181_p10), %s2535_s15, 1  ;;  %v2445_v2 = vld [vmem:[%s3055_s1 + $0x8] sm:$0xff] (!%p181_p10)   ;;  %vm2546_vm0 = vmmov (!%p181_p10), 0   ;;  %vm300_vm1 = vcmask (!%p181_p10), 130048  }
   0xf   : > { %184 = sbr.rel (%p181_p10) target bundleno = 414 (0x19e), region = 32  ;;  %2229 = vmatprep.subr.bf16.mxu0 (!%p181_p10), %v2545_v1  ;;  %2267 = vmatprep.subr.bf16.mxu1 (!%p181_p10), %v2545_v1  ;;  %v2446_v3 = vld [vmem:[%s3055_s1 + $0x10] sm:$0xff] (!%p181_p10)   ;;  %vm478_vm2 = vsmask.f32 (!%p181_p10), 3328  ;;  %vm479_vm3 = vsmask.f32 (!%p181_p10), 7440 }
  0x10   : > { %2230 = vmatpush3.bf16.msra.mxu0 (!%p181_p10), %v2443_v0  ;;  %2231 = vmatprep.mubr.msk.bf16.mxu0 (!%p181_p10), %vm2546_vm0, %v2545_v1  ;;  %vm2662_vm4 = vmor (!%p181_p10), %vm478_vm2, %vm479_vm3  ;;  %v2448_v46 = vld [vmem:[%s3055_s1 + $0x18] sm:$0xff] (!%p181_p10)   ;;  %s208_s21 = sand.u32 (!%p181_p10), 1, %s2527_s13   ;;  %s2383_s27 = smul.u32 (!%p181_p10), 1152, %s2535_s15 }
  0x11   : > { %2268 = vmatpush3.bf16.msra.mxu1 (!%p181_p10), %v2445_v2  ;;  %2305 = vmatprep.subr.bf16.mxu0 (!%p181_p10), %v2545_v1  ;;  %s2381_s23 = smul.u32 (!%p181_p10), 72, %s208_s21  ;;  %s2547_s6 = smov (!%p181_p10), [#allocation3]  }
  0x12   : > { %2269 = vmatprep.mubr.msk.bf16.mxu1 (!%p181_p10), %vm2546_vm0, %v2545_v1  ;;  %2343 = vmatprep.subr.bf16.mxu1 (!%p181_p10), %v2545_v1 }
  0x13   : > { %s2959_s26 = scalar_lea.vmem (!%p181_p10), [#allocation3], %s2381_s23 }
  0x14   : > { %s1851_s28 = sshll.u32 (!%p181_p10), %s2959_s26, 4  ;;  %s3003_s28 = int_to_ptr.vmem [resolvable:$true] %s1851_s28 }
  0x15   : > { %s2465_s5 = scalar_lea.vmem (!%p181_p10), %s3003_s28, 1152 }
  0x16   : > { %s212_s30 = scalar_select %p211_p11, %s2535_s15, 1 }
  0x17   : > { %s3008_s15 = scalar_lea.sflag [#allocation4], %s208_s21  ;;  %p2466_p12 = scmp.ne.s32.totalorder %s3003_s28, %s2465_s5 }
  0x18   : > { %s2382_s4 = smul.u32 120, %s212_s30 }
  0x19   : > { %p2467_p13 = pnand %p2466_p12, %p2610_p4 }
  0x1a   : > { %s2644_s7 = scalar_lea.vmem %s3054_s0, %s2382_s4  ;;  %s3001_s4 = scalar_lea.hbm %s3057_s3, %s2383_s27 }
  0x1b   : > { %v2444_v4 = vld [vmem:[%s2644_s7] sm:$0xff]   ;;  %v453_v7 = vld [vmem:[%s2644_s7 + $0x8] sm:$0x1]  ;;  %v2447_v12 = vld [vmem:[%s2644_s7 + $0xc] sm:$0xff]   ;;  %p2468_p0 = pneg %p2467_p13 }
  0x1c   : > { %2232 = vmatmul.mubr.msk.bf16.vlgmr.msra.gmra.mrb[0].mxu0 %vm300_vm1, %v2444_v4  ;;  %v451_v5 = vld [vmem:[%s2644_s7] sm:$0xf]  ;;  %v452_v6 = vld [vmem:[%s2644_s7 + $0x4] sm:$0xf]  ;;  %v501_v13 = vshll.u32 %v453_v7, 16  ;;  %v2449_v58 = vld [vmem:[%s2644_s7 + $0x18] sm:$0xff]  }
  0x1d   : > { %2235 = vmatprep.mubr.msk.bf16.mxu0 %vm2546_vm0, %v2545_v1  ;;  %2306 = vmatpush3.bf16.msra.mxu0 %v2446_v3  ;;  %v482_v8 = vshrl.u32 %v451_v5, 16  ;;  %v485_v9 = vshll.u32 %v451_v5, 16  ;;  %v491_v10 = vshll.u32 %v452_v6, 16  ;;  %v495_v11 = vshrl.u32 %v452_v6, 16  ;;  %v454_v14 = vld [vmem:[%s2644_s7 + $0xc] sm:$0xf] }
  0x1e   : > { %v455_v19 = vld [vmem:[%s2644_s7 + $0x10] sm:$0xf]  ;;  %v503_v20 = vrot.slane %v501_v13, 5  ;;  %v456_v21 = vld [vmem:[%s2644_s7 + $0x14] sm:$0x1]  ;;  %v506_v22 = vshrl.u32 %v454_v14, 16 }
  0x1f   : > { %v484_v15 = vrot.slane %v482_v8, 4  ;;  %v487_v16 = vrot.slane %v485_v9, 5  ;;  %v493_v17 = vrot.slane %v491_v10, 5  ;;  %v497_v18 = vrot.slane %v495_v11, 4  ;;  %v457_v33 = vld [vmem:[%s2644_s7 + $0x18] sm:$0xf] }
  0x20   : > { %v509_v23 = vshll.u32 %v454_v14, 16  ;;  %v515_v24 = vshll.u32 %v455_v19, 16  ;;  %v519_v27 = vshrl.u32 %v455_v19, 16  ;;  %v525_v28 = vshll.u32 %v456_v21, 16  ;;  %v458_v38 = vld [vmem:[%s2644_s7 + $0x1c] sm:$0xf] }
  0x21   : > { %v488_v25 = vor.u32 %v487_v16, %v484_v15  ;;  %v498_v26 = vor.u32 %v497_v18, %v493_v17  ;;  %v508_v30 = vrot.slane %v506_v22, 4  ;;  %v459_v40 = vld [vmem:[%s2644_s7 + $0x20] sm:$0x1]  ;;  %v530_v41 = vshrl.u32 %v457_v33, 16  ;;  %v460_v53 = vld [vmem:[%s2644_s7 + $0x24] sm:$0xf] }
  0x22   : > { %v511_v31 = vrot.slane %v509_v23, 5  ;;  %v517_v32 = vrot.slane %v515_v24, 5  ;;  %v521_v36 = vrot.slane %v519_v27, 4  ;;  %v527_v37 = vrot.slane %v525_v28, 5  ;;  %v461_v57 = vld [vmem:[%s2644_s7 + $0x28] sm:$0xf] }
  0x23   : > { %v489_v34 = vrot.slane %v488_v25, 4  ;;  %v499_v35 = vrot.slane %v498_v26, 4  ;;  %v533_v42 = vshll.u32 %v457_v33, 16  ;;  %v539_v43 = vshll.u32 %v458_v38, 16  ;;  %v462_v5 = vld [vmem:[%s2644_s7 + $0x2c] sm:$0x1] }
  0x24   : > { %2236 = vmatmul.mubr.msk.bf16.gmra.mrb[4].mxu0 %vm300_vm1, %v2447_v12  ;;  %v512_v39 = vor.u32 %v511_v31, %v508_v30  ;;  %v522_v47 = vor.u32 %v521_v36, %v517_v32  ;;  %v543_v48 = vshrl.u32 %v458_v38, 16  ;;  %v532_v51 = vrot.slane %v530_v41, 4  ;;  %v463_v14 = vld [vmem:[%s2644_s7 + $0x30] sm:$0xf]  ;;  %v464_v15 = vld [vmem:[%s2644_s7 + $0x34] sm:$0xf] }
  0x25   : > { %v494_v44 = vsel %vm2662_vm4, %v489_v34, %v493_v17  ;;  %v504_v45 = vsel %vm2662_vm4, %v499_v35, %v503_v20  ;;  %2239 = vmatprep.mubr.msk.bf16.mxu0 %vm2546_vm0, %v2545_v1  ;;  %v535_v52 = vrot.slane %v533_v42, 5  ;;  %v541_v55 = vrot.slane %v539_v43, 5  ;;  %v2450_v16 = vld [vmem:[%s2644_s7 + $0x24] sm:$0xff]   ;;  %v465_v26 = vld [vmem:[%s2644_s7 + $0x38] sm:$0x1] }
  0x26   : > { %v1990_v49 = vcombine.low %v494_v44, %v504_v45  ;;  %v513_v50 = vrot.slane %v512_v39, 4  ;;  %v523_v54 = vrot.slane %v522_v47, 4  ;;  %v545_v56 = vrot.slane %v543_v48, 4  ;;  %v466_v36 = vld [vmem:[%s2644_s7 + $0x3c] sm:$0xf]  ;;  %v2451_v39 = vld [vmem:[%s2644_s7 + $0x30] sm:$0xff]  }
  0x27   : > { %v536_v59 = vor.u32 %v535_v52, %v532_v51  ;;  %v549_v60 = vshll.u32 %v459_v40, 16  ;;  %v554_v61 = vshrl.u32 %v460_v53, 16  ;;  %v557_v62 = vshll.u32 %v460_v53, 16 }
  0x28   : > { %2270 = vmatmul.mubr.msk.bf16.vlgmr.msra.gmra.mrb[0].mxu1 %vm300_vm1, %v1990_v49  ;;  %v518_v63 = vsel %vm2662_vm4, %v513_v50, %v517_v32  ;;  %v528_v0 = vsel %vm2662_vm4, %v523_v54, %v527_v37  ;;  %v546_v2 = vor.u32 %v545_v56, %v541_v55  ;;  %v563_v3 = vshll.u32 %v461_v57, 16  ;;  %v467_v37 = vld [vmem:[%s2644_s7 + $0x40] sm:$0xf]  ;;  %v468_v50 = vld [vmem:[%s2644_s7 + $0x44] sm:$0x1] }
  0x29   : > { %2344 = vmatpush3.bf16.msra.mxu1 %v2448_v46  ;;  %2273 = vmatprep.mubr.msk.bf16.mxu1 %vm2546_vm0, %v2545_v1  ;;  %v537_v4 = vrot.slane %v536_v59, 4  ;;  %v567_v6 = vshrl.u32 %v461_v57, 16  ;;  %v1991_v7 = vcombine.low %v518_v63, %v528_v0  ;;  %v556_v8 = vrot.slane %v554_v61, 4  ;;  %v469_v57 = vld [vmem:[%s2644_s7 + $0x48] sm:$0xf] }
  0x2a   : > { %v559_v9 = vrot.slane %v557_v62, 5  ;;  %v547_v10 = vrot.slane %v546_v2, 4  ;;  %v551_v11 = vrot.slane %v549_v60, 5  ;;  %v565_v12 = vrot.slane %v563_v3, 5  ;;  %v2452_v60 = vld [vmem:[%s2644_s7 + $0x3c] sm:$0xff]  }
  0x2b   : > { %v569_v13 = vrot.slane %v567_v6, 4  ;;  %v573_v17 = vshll.u32 %v462_v5, 16  ;;  %v542_v18 = vsel %vm2662_vm4, %v537_v4, %v541_v55  ;;  %v578_v20 = vshrl.u32 %v463_v14, 16 }
  0x2c   : > { %2240 = vmatmul.mubr.msk.bf16.gmra.mrb[8].mxu0 %vm300_vm1, %v2449_v58  ;;  %v560_v19 = vor.u32 %v559_v9, %v556_v8  ;;  %v581_v21 = vshll.u32 %v463_v14, 16  ;;  %v552_v22 = vsel %vm2662_vm4, %v547_v10, %v551_v11  ;;  %v587_v24 = vshll.u32 %v464_v15, 16  ;;  %v470_v58 = vld [vmem:[%s2644_s7 + $0x4c] sm:$0xf]  ;;  %v471_v8 = vld [vmem:[%s2644_s7 + $0x50] sm:$0x1] }
  0x2d   : > { %2243 = vmatprep.mubr.msk.bf16.mxu0 %vm2546_vm0, %v2545_v1  ;;  %v570_v23 = vor.u32 %v569_v13, %v565_v12  ;;  %v591_v25 = vshrl.u32 %v464_v15, 16  ;;  %v1992_v27 = vcombine.low %v542_v18, %v552_v22  ;;  %v580_v30 = vrot.slane %v578_v20, 4  ;;  %v472_v15 = vld [vmem:[%s2644_s7 + $0x54] sm:$0xf]  ;;  %v2453_v18 = vld [vmem:[%s2644_s7 + $0x48] sm:$0xff]  }
  0x2e   : > { %v561_v28 = vrot.slane %v560_v19, 4  ;;  %v583_v31 = vrot.slane %v581_v21, 5  ;;  %v575_v33 = vrot.slane %v573_v17, 5  ;;  %v589_v34 = vrot.slane %v587_v24, 5 }
  0x2f   : > { %v571_v32 = vrot.slane %v570_v23, 4  ;;  %v593_v35 = vrot.slane %v591_v25, 4  ;;  %v597_v38 = vshll.u32 %v465_v26, 16  ;;  %v602_v42 = vshrl.u32 %v466_v36, 16 }
  0x30   : > { %2274 = vmatmul.mubr.msk.bf16.gmra.mrb[4].mxu1 %vm300_vm1, %v1991_v7  ;;  %v566_v40 = vsel %vm2662_vm4, %v561_v28, %v565_v12  ;;  %v584_v41 = vor.u32 %v583_v31, %v580_v30  ;;  %v605_v43 = vshll.u32 %v466_v36, 16  ;;  %v611_v46 = vshll.u32 %v467_v37, 16 }
  0x31   : > { %2277 = vmatprep.mubr.msk.bf16.mxu1 %vm2546_vm0, %v2545_v1  ;;  %v576_v44 = vsel %vm2662_vm4, %v571_v32, %v575_v33  ;;  %v594_v45 = vor.u32 %v593_v35, %v589_v34  ;;  %v615_v47 = vshrl.u32 %v467_v37, 16  ;;  %v604_v51 = vrot.slane %v602_v42, 4  ;;  %v475_v32 = vld [vmem:[%s2644_s7 + $0x60] sm:$0xf]  ;;  %v474_v35 = vld [vmem:[%s2644_s7 + $0x5c] sm:$0x1] }
  0x32   : > { %v1993_v48 = vcombine.low %v566_v40, %v576_v44  ;;  %v585_v49 = vrot.slane %v584_v41, 4  ;;  %v607_v52 = vrot.slane %v605_v43, 5  ;;  %v599_v54 = vrot.slane %v597_v38, 5  ;;  %v476_v38 = vld [vmem:[%s2644_s7 + $0x64] sm:$0xf]  ;;  %v2454_v41 = vld [vmem:[%s2644_s7 + $0x54] sm:$0xff]  }
  0x33   : > { %v595_v53 = vrot.slane %v594_v45, 4  ;;  %v613_v55 = vrot.slane %v611_v46, 5  ;;  %v617_v56 = vrot.slane %v615_v47, 4  ;;  %v621_v59 = vshll.u32 %v468_v50, 16 }
  0x34   : > { %2244 = vmatmul.mubr.msk.bf16.gmra.mrb[12].mxu0 %vm300_vm1, %v2450_v16  ;;  %v590_v61 = vsel %vm2662_vm4, %v585_v49, %v589_v34  ;;  %v608_v62 = vor.u32 %v607_v52, %v604_v51  ;;  %v626_v63 = vshrl.u32 %v469_v57, 16  ;;  %v629_v0 = vshll.u32 %v469_v57, 16  ;;  %v473_v16 = vld [vmem:[%s2644_s7 + $0x58] sm:$0xf] }
  0x35   : > { %2247 = vmatprep.mubr.msk.bf16.mxu0 %vm2546_vm0, %v2545_v1  ;;  %v600_v2 = vsel %vm2662_vm4, %v595_v53, %v599_v54  ;;  %v618_v3 = vor.u32 %v617_v56, %v613_v55  ;;  %v635_v4 = vshll.u32 %v470_v58, 16  ;;  %v639_v5 = vshrl.u32 %v470_v58, 16  ;;  %v477_v53 = vld [vmem:[%s2644_s7 + $0x68] sm:$0x1]  ;;  %v2048_v54 = vld [vmem:[%s2644_s7 + $0xc] sm:$0xf] }
  0x36   : > { %v1994_v6 = vcombine.low %v590_v61, %v600_v2  ;;  %v609_v7 = vrot.slane %v608_v62, 4  ;;  %v628_v9 = vrot.slane %v626_v63, 4  ;;  %v631_v10 = vrot.slane %v629_v0, 5  ;;  %v2455_v61 = vld [vmem:[%s2644_s7 + $0x60] sm:$0xff]  }
  0x37   : > { %v619_v11 = vrot.slane %v618_v3, 4  ;;  %v623_v12 = vrot.slane %v621_v59, 5  ;;  %v637_v13 = vrot.slane %v635_v4, 5  ;;  %v641_v14 = vrot.slane %v639_v5, 4  ;;  %v2049_v59 = vld [vmem:[%s2644_s7 + $0x10] sm:$0xf] }
  0x38   : > { %2278 = vmatmul.mubr.msk.bf16.gmra.mrb[8].mxu1 %vm300_vm1, %v1992_v27  ;;  %v645_v17 = vshll.u32 %v471_v8, 16  ;;  %v614_v19 = vsel %vm2662_vm4, %v609_v7, %v613_v55  ;;  %v632_v20 = vor.u32 %v631_v10, %v628_v9  ;;  %v650_v21 = vshrl.u32 %v472_v15, 16  ;;  %v2050_v9 = vld [vmem:[%s2644_s7 + $0x14] sm:$0x1] }
  0x39   : > { %2281 = vmatprep.mubr.msk.bf16.mxu1 %vm2546_vm0, %v2545_v1  ;;  %v653_v22 = vshll.u32 %v472_v15, 16  ;;  %v624_v23 = vsel %vm2662_vm4, %v619_v11, %v623_v12  ;;  %v642_v24 = vor.u32 %v641_v14, %v637_v13  ;;  %v659_v25 = vshll.u32 %v473_v16, 16 }
  0x3a   : > { %v663_v26 = vshrl.u32 %v473_v16, 16  ;;  %v1995_v27 = vcombine.low %v614_v19, %v624_v23  ;;  %v633_v28 = vrot.slane %v632_v20, 4  ;;  %v652_v30 = vrot.slane %v650_v21, 4  ;;  %v2051_v16 = vld [vmem:[%s2644_s7 + $0x18] sm:$0xf]  ;;  %v2456_v19 = vld [vmem:[%s2644_s7 + $0xc] sm:$0xff]  }
  0x3b   : > { %v655_v31 = vrot.slane %v653_v22, 5  ;;  %v643_v33 = vrot.slane %v642_v24, 4  ;;  %v647_v34 = vrot.slane %v645_v17, 5  ;;  %v661_v36 = vrot.slane %v659_v25, 5  ;;  %v2052_v17 = vld [vmem:[%s2644_s7 + $0x1c] sm:$0xf] }
  0x3c   : > { %2248 = vmatmul.mubr.msk.bf16.gmra.mrb[16].mxu0 %vm300_vm1, %v2451_v39  ;;  %v665_v37 = vrot.slane %v663_v26, 4  ;;  %v674_v39 = vshrl.u32 %v475_v32, 16  ;;  %v677_v40 = vshll.u32 %v475_v32, 16  ;;  %v638_v42 = vsel %vm2662_vm4, %v633_v28, %v637_v13 }
  0x3d   : > { %2251 = vmatprep.mubr.msk.bf16.mxu0 %vm2546_vm0, %v2545_v1  ;;  %v656_v43 = vor.u32 %v655_v31, %v652_v30  ;;  %v669_v44 = vshll.u32 %v474_v35, 16  ;;  %v648_v45 = vsel %vm2662_vm4, %v643_v33, %v647_v34  ;;  %v683_v47 = vshll.u32 %v476_v38, 16  ;;  %v2053_v31 = vld [vmem:[%s2644_s7 + $0x20] sm:$0x1] }
  0x3e   : > { %v666_v46 = vor.u32 %v665_v37, %v661_v36  ;;  %v676_v49 = vrot.slane %v674_v39, 4  ;;  %v679_v50 = vrot.slane %v677_v40, 5  ;;  %v1996_v51 = vcombine.low %v638_v42, %v648_v45  ;;  %v2055_v39 = vld [vmem:[%s2644_s7 + $0x28] sm:$0xf] }
  0x3f   : > { %v657_v52 = vrot.slane %v656_v43, 4  ;;  %v671_v56 = vrot.slane %v669_v44, 5  ;;  %v685_v57 = vrot.slane %v683_v47, 5  ;;  %v693_v63 = vshll.u32 %v477_v53, 16 }
  0x40   : > { %2282 = vmatmul.mubr.msk.bf16.gmra.mrb[12].mxu1 %vm300_vm1, %v1993_v48  ;;  %v687_v48 = vshrl.u32 %v476_v38, 16  ;;  %v667_v55 = vrot.slane %v666_v46, 4  ;;  %v1209_v0 = vshrl.u32 %v2048_v54, 16  ;;  %v1212_v2 = vshll.u32 %v2048_v54, 16  ;;  %v2054_v38 = vld [vmem:[%s2644_s7 + $0x24] sm:$0xf] }
  0x41   : > { %2285 = vmatprep.mubr.msk.bf16.mxu1 %vm2546_vm0, %v2545_v1  ;;  %v662_v62 = vsel %vm2662_vm4, %v657_v52, %v661_v36  ;;  %v1218_v5 = vshll.u32 %v2049_v59, 16  ;;  %v695_v13 = vrot.slane %v693_v63, 5  ;;  %v1228_v21 = vshll.u32 %v2050_v9, 16  ;;  %v2056_v52 = vld [vmem:[%s2644_s7 + $0x2c] sm:$0x1] }
  0x42   : > { %v689_v58 = vrot.slane %v687_v48, 4  ;;  %v672_v3 = vsel %vm2662_vm4, %v667_v55, %v671_v56  ;;  %v1211_v10 = vrot.slane %v1209_v0, 4  ;;  %v1214_v11 = vrot.slane %v1212_v2, 5 }
  0x43   : > { %v1997_v8 = vcombine.low %v662_v62, %v672_v3  ;;  %v1220_v14 = vrot.slane %v1218_v5, 5  ;;  %v1233_v22 = vshrl.u32 %v2051_v16, 16  ;;  %v1236_v23 = vshll.u32 %v2051_v16, 16  ;;  %v2458_v62 = vld [vmem:[%s2644_s7 + $0x24] sm:$0xff]  }
  0x44   : > { %2252 = vmatmul.mubr.msk.bf16.gmra.mrb[20].mxu0 %vm300_vm1, %v2452_v60  ;;  %v680_v60 = vor.u32 %v679_v50, %v676_v49  ;;  %v690_v4 = vor.u32 %v689_v58, %v685_v57  ;;  %v1215_v20 = vor.u32 %v1214_v11, %v1211_v10  ;;  %v1242_v26 = vshll.u32 %v2052_v17, 16 }
  0x45   : > { %2255 = vmatprep.mubr.msk.bf16.mxu0 %vm2546_vm0, %v2545_v1  ;;  %v1235_v32 = vrot.slane %v1233_v22, 4  ;;  %v1238_v33 = vrot.slane %v1236_v23, 5  ;;  %v1230_v35 = vrot.slane %v1228_v21, 5  ;;  %v1252_v40 = vshll.u32 %v2053_v31, 16  ;;  %v2459_v21 = vld [vmem:[%s2644_s7 + $0x30] sm:$0xff]  }
  0x46   : > { %v681_v7 = vrot.slane %v680_v60, 4  ;;  %v691_v12 = vrot.slane %v690_v4, 4  ;;  %v1216_v30 = vrot.slane %v1215_v20, 4  ;;  %v1244_v36 = vrot.slane %v1242_v26, 5  ;;  %v2058_v60 = vld [vmem:[%s2644_s7 + $0x34] sm:$0xf] }
  0x47   : > { %v1239_v43 = vor.u32 %v1238_v33, %v1235_v32  ;;  %v1257_v44 = vshrl.u32 %v2054_v38, 16  ;;  %v1260_v45 = vshll.u32 %v2054_v38, 16  ;;  %v1266_v48 = vshll.u32 %v2055_v39, 16  ;;  %v2062_v38 = vld [vmem:[%s2644_s7 + $0x44] sm:$0x1] }
  0x48   : > { %2286 = vmatmul.mubr.msk.bf16.gmra.mrb[16].mxu1 %vm300_vm1, %v1994_v6  ;;  %v1222_v6 = vshrl.u32 %v2049_v59, 16  ;;  %v696_v24 = vsel %vm2662_vm4, %v691_v12, %v695_v13  ;;  %v1221_v42 = vsel %vm2662_vm4, %v1216_v30, %v1220_v14  ;;  %v1270_v49 = vshrl.u32 %v2055_v39, 16  ;;  %v2057_v59 = vld [vmem:[%s2644_s7 + $0x30] sm:$0xf]  ;;  %v2060_v12 = vld [vmem:[%s2644_s7 + $0x3c] sm:$0xf] }
  0x49   : > { %2289 = vmatprep.mubr.msk.bf16.mxu1 %vm2546_vm0, %v2545_v1  ;;  %v1259_v53 = vrot.slane %v1257_v44, 4  ;;  %v1262_v54 = vrot.slane %v1260_v45, 5  ;;  %v1254_v56 = vrot.slane %v1252_v40, 5  ;;  %v1281_v2 = vshrl.u32 %v2057_v59, 16  ;;  %v2063_v39 = vld [vmem:[%s2644_s7 + $0x48] sm:$0xf] }
  0x4a   : > { %v1224_v15 = vrot.slane %v1222_v6, 4  ;;  %v1272_v58 = vrot.slane %v1270_v49, 4  ;;  %v1284_v3 = vshll.u32 %v2057_v59, 16  ;;  %v1290_v6 = vshll.u32 %v2058_v60, 16  ;;  %v2064_v40 = vld [vmem:[%s2644_s7 + $0x4c] sm:$0xf] }
  0x4b   : > { %v1263_v0 = vor.u32 %v1262_v54, %v1259_v53  ;;  %v1283_v10 = vrot.slane %v1281_v2, 4  ;;  %v1308_v20 = vshll.u32 %v2060_v12, 16  ;;  %v1324_v45 = vshll.u32 %v2062_v38, 16 }
  0x4c   : > { %2256 = vmatmul.mubr.msk.bf16.gmra.mrb[24].mxu0 %vm300_vm1, %v2453_v18  ;;  %v686_v18 = vsel %vm2662_vm4, %v681_v7, %v685_v57  ;;  %v1225_v25 = vor.u32 %v1224_v15, %v1220_v14  ;;  %v1268_v57 = vrot.slane %v1266_v48, 5  ;;  %v1294_v7 = vshrl.u32 %v2058_v60, 16  ;;  %v2067_v60 = vld [vmem:[%s2644_s7 + $0x58] sm:$0xf] }
  0x4d   : > { %2259 = vmatprep.mubr.msk.bf16.mxu0 %vm2546_vm0, %v2545_v1  ;;  %v1998_v28 = vcombine.low %v686_v18, %v696_v24  ;;  %v1286_v11 = vrot.slane %v1284_v3, 5  ;;  %v1264_v13 = vrot.slane %v1263_v0, 4  ;;  %v1292_v15 = vrot.slane %v1290_v6, 5  ;;  %v2059_v18 = vld [vmem:[%s2644_s7 + $0x38] sm:$0x1]  ;;  %v2461_v0 = vld [vmem:[%s2644_s7 + $0x48] sm:$0xff]  }
  0x4e   : > { %v1226_v34 = vrot.slane %v1225_v25, 4  ;;  %v1273_v5 = vor.u32 %v1272_v58, %v1268_v57  ;;  %v1296_v16 = vrot.slane %v1294_v7, 4  ;;  %v1310_v31 = vrot.slane %v1308_v20, 5 }
  0x4f   : > { %v1287_v22 = vor.u32 %v1286_v11, %v1283_v10  ;;  %v1269_v25 = vsel %vm2662_vm4, %v1264_v13, %v1268_v57  ;;  %v1332_v48 = vshll.u32 %v2063_v39, 16  ;;  %v1338_v49 = vshll.u32 %v2064_v40, 16 }
  0x50   : > { %2290 = vmatmul.mubr.msk.bf16.gmra.mrb[20].mxu1 %vm300_vm1, %v1995_v27  ;;  %v1246_v27 = vshrl.u32 %v2052_v17, 16  ;;  %v1231_v46 = vsel %vm2662_vm4, %v1226_v34, %v1230_v35  ;;  %v1274_v14 = vrot.slane %v1273_v5, 4  ;;  %v2061_v17 = vld [vmem:[%s2644_s7 + $0x40] sm:$0xf]  ;;  %v1326_v54 = vrot.slane %v1324_v45, 5 }
  0x51   : > { %2293 = vmatprep.mubr.msk.bf16.mxu1 %vm2546_vm0, %v2545_v1  ;;  %v2077_v50 = vcombine.low %v1221_v42, %v1231_v46  ;;  %v1314_v23 = vshll.u32 %v2061_v17, 16  ;;  %v1318_v24 = vshrl.u32 %v2061_v17, 16  ;;  %v1288_v33 = vrot.slane %v1287_v22, 4  ;;  %v2460_v42 = vld [vmem:[%s2644_s7 + $0x3c] sm:$0xff]   ;;  %v2462_v22 = vld [vmem:[%s2644_s7 + $0x54] sm:$0xff]  }
  0x52   : > { %v1248_v37 = vrot.slane %v1246_v27, 4  ;;  %v1297_v27 = vor.u32 %v1296_v16, %v1292_v15  ;;  %v1329_v46 = vshrl.u32 %v2063_v39, 16  ;;  %v1334_v57 = vrot.slane %v1332_v48, 5 }
  0x53   : > { %v1316_v34 = vrot.slane %v1314_v23, 5  ;;  %v1320_v35 = vrot.slane %v1318_v24, 4  ;;  %v1340_v58 = vrot.slane %v1338_v49, 5  ;;  %v1366_v5 = vshrl.u32 %v2067_v60, 16 }
  0x54   : > { %2260 = vmatmul.mubr.msk.bf16.gmra.mrb[28].mxu0 %vm300_vm1, %v2454_v41  ;;  %v2457_v41 = vld [vmem:[%s2644_s7 + $0x18] sm:$0xff]   ;;  %v1249_v47 = vor.u32 %v1248_v37, %v1244_v36 }
  0x55   : > { %2263 = vmatprep.mubr.msk.bf16.mxu0 %vm2546_vm0, %v2545_v1  ;;  %v1321_v44 = vor.u32 %v1320_v35, %v1316_v34  ;;  %v1368_v13 = vrot.slane %v1366_v5, 4 }
  0x56   : > { %v1250_v55 = vrot.slane %v1249_v47, 4 }
  0x57   : > { %v1322_v53 = vrot.slane %v1321_v44, 4 }
  0x58   : > { %2294 = vmatmul.mubr.msk.bf16.gmra.mrb[24].mxu1 %vm300_vm1, %v1996_v51  ;;  %v1240_v51 = vrot.slane %v1239_v43, 4  ;;  %v1255_v4 = vsel %vm2662_vm4, %v1250_v55, %v1254_v56  ;;  %v1293_v43 = vsel %vm2662_vm4, %v1288_v33, %v1292_v15  ;;  %v2066_v55 = vld [vmem:[%s2644_s7 + $0x54] sm:$0xf]  ;;  %v1331_v56 = vrot.slane %v1329_v46, 4 }
  0x59   : > { %2297 = vmatprep.mubr.msk.bf16.mxu1 %vm2546_vm0, %v2545_v1  ;;  %v1327_v2 = vsel %vm2662_vm4, %v1322_v53, %v1326_v54  ;;  %v1356_v3 = vshll.u32 %v2066_v55, 16 }
  0x5a   : > { %v1245_v63 = vsel %vm2662_vm4, %v1240_v51, %v1244_v36  ;;  %v1298_v36 = vrot.slane %v1297_v27, 4  ;;  %v1335_v6 = vor.u32 %v1334_v57, %v1331_v56 }
  0x5b   : > { %v1358_v11 = vrot.slane %v1356_v3, 5 }
  0x5c   : > { %2264 = vmatmul.mubr.msk.bf16.gmra.mrb[32].mxu0 %vm300_vm1, %v2455_v61  ;;  %v1276_v61 = vshll.u32 %v2056_v52, 16  ;;  %v1336_v15 = vrot.slane %v1335_v6, 4 }
  0x5d   : > { %2307 = vmatprep.mubr.msk.bf16.mxu0 %vm2546_vm0, %v2545_v1 }
  0x5e   : > { %v1278_v9 = vrot.slane %v1276_v61, 5  ;;  %v2065_v61 = vld [vmem:[%s2644_s7 + $0x50] sm:$0x1] }
  0x60   : > { %2298 = vmatmul.mubr.msk.bf16.gmra.mrb[28].mxu1 %vm300_vm1, %v1997_v8  ;;  %v2078_v8 = vcombine.low %v1245_v63, %v1255_v4  ;;  %v1279_v26 = vsel %vm2662_vm4, %v1274_v14, %v1278_v9  ;;  %v1353_v63 = vshrl.u32 %v2066_v55, 16  ;;  %v1362_v4 = vshll.u32 %v2067_v60, 16  ;;  %v2069_v14 = vld [vmem:[%s2644_s7 + $0x60] sm:$0xf]  ;;  %v2074_v60 = vld [vmem:[%s2644_s7 + $0x74] sm:$0x1] }
  0x61   : > { %2301 = vmatprep.mubr.msk.bf16.mxu1 %vm2546_vm0, %v2545_v1  ;;  %v2079_v32 = vcombine.low %v1269_v25, %v1279_v26  ;;  %v1377_v20 = vshrl.u32 %v2069_v14, 16  ;;  %v1341_v26 = vsel %vm2662_vm4, %v1336_v15, %v1340_v58  ;;  %v1420_v3 = vshll.u32 %v2074_v60, 16 }
  0x62   : > { %v1355_v10 = vrot.slane %v1353_v63, 4 }
  0x64   : > { %2308 = vmatmul.mubr.msk.bf16.vlgmr.msra.gmra.mrb[36].mxu0 %vm300_vm1, %v2456_v19  ;;  %v1305_v19 = vshrl.u32 %v2060_v12, 16  ;;  %v1364_v12 = vrot.slane %v1362_v4, 5  ;;  %v1359_v23 = vor.u32 %v1358_v11, %v1355_v10 }
  0x65   : > { %2311 = vmatprep.mubr.msk.bf16.mxu0 %vm2546_vm0, %v2545_v1 }
  0x66   : > { %v1307_v30 = vrot.slane %v1305_v19, 4  ;;  %v2070_v19 = vld [vmem:[%s2644_s7 + $0x64] sm:$0xf]  ;;  %v1369_v24 = vor.u32 %v1368_v13, %v1364_v12 }
  0x68   : > { %2302 = vmatmul.mubr.msk.bf16.gmra.mrb[32].mxu1 %vm300_vm1, %v1998_v28  ;;  %v1300_v28 = vshll.u32 %v2059_v18, 16  ;;  %v2068_v18 = vld [vmem:[%s2644_s7 + $0x5c] sm:$0x1]  ;;  %v1370_v35 = vrot.slane %v1369_v24, 4 }
  0x69   : > { %2345 = vmatprep.mubr.msk.bf16.mxu1 %vm2546_vm0, %v2545_v1  ;;  %v1372_v25 = vshll.u32 %v2068_v18, 16 }
  0x6a   : > { %v1302_v37 = vrot.slane %v1300_v28, 5  ;;  %v1386_v28 = vshll.u32 %v2070_v19, 16 }
  0x6c   : > { %2312 = vmatmul.mubr.msk.bf16.gmra.mrb[40].mxu0 %vm300_vm1, %v2457_v41  ;;  %v1311_v41 = vor.u32 %v1310_v31, %v1307_v30  ;;  %v1303_v47 = vsel %vm2662_vm4, %v1298_v36, %v1302_v37  ;;  %v1390_v30 = vshrl.u32 %v2070_v19, 16  ;;  %v1379_v31 = vrot.slane %v1377_v20, 4  ;;  %v2071_v37 = vld [vmem:[%s2644_s7 + $0x68] sm:$0x1] }
  0x6d   : > { %2315 = vmatprep.mubr.msk.bf16.mxu0 %vm2546_vm0, %v2545_v1  ;;  %v2080_v52 = vcombine.low %v1293_v43, %v1303_v47  ;;  %v1374_v36 = vrot.slane %v1372_v25, 5  ;;  %v1388_v38 = vrot.slane %v1386_v28, 5  ;;  %v2463_v43 = vld [vmem:[%s2644_s7 + $0x60] sm:$0xff]   ;;  %v1396_v46 = vshll.u32 %v2071_v37, 16 }
  0x6e   : > { %v1312_v51 = vrot.slane %v1311_v41, 4  ;;  %v1392_v39 = vrot.slane %v1390_v30, 4  ;;  %v2073_v41 = vld [vmem:[%s2644_s7 + $0x70] sm:$0xf] }
  0x6f   : > { %v1375_v45 = vsel %vm2662_vm4, %v1370_v35, %v1374_v36  ;;  %v1398_v54 = vrot.slane %v1396_v46, 5 }
  0x70   : > { %2346 = vmatmul.mubr.msk.bf16.vlgmr.msra.gmra.mrb[36].mxu1 %vm300_vm1, %v2077_v50  ;;  %v1342_v50 = vshrl.u32 %v2064_v40, 16  ;;  %v2072_v40 = vld [vmem:[%s2644_s7 + $0x6c] sm:$0xf]  ;;  %v1393_v48 = vor.u32 %v1392_v39, %v1388_v38 }
  0x71   : > { %2349 = vmatprep.mubr.msk.bf16.mxu1 %vm2546_vm0, %v2545_v1  ;;  %v1401_v47 = vshrl.u32 %v2072_v40, 16  ;;  %v1404_v49 = vshll.u32 %v2072_v40, 16 }
  0x72   : > { %v1344_v59 = vrot.slane %v1342_v50, 4  ;;  %v1410_v50 = vshll.u32 %v2073_v41, 16  ;;  %v1394_v56 = vrot.slane %v1393_v48, 4 }
  0x73   : > { %v1403_v55 = vrot.slane %v1401_v47, 4  ;;  %v1406_v57 = vrot.slane %v1404_v49, 5 }
  0x74   : > { %2316 = vmatmul.mubr.msk.bf16.gmra.mrb[44].mxu0 %vm300_vm1, %v2458_v62  ;;  %v1317_v62 = vsel %vm2662_vm4, %v1312_v51, %v1316_v34  ;;  %v1345_v7 = vor.u32 %v1344_v59, %v1340_v58  ;;  %v1360_v34 = vrot.slane %v1359_v23, 4  ;;  %v1414_v51 = vshrl.u32 %v2073_v41, 16 }
  0x75   : > { %2319 = vmatprep.mubr.msk.bf16.mxu0 %vm2546_vm0, %v2545_v1  ;;  %v2081_v9 = vcombine.low %v1317_v62, %v1327_v2  ;;  %v1412_v58 = vrot.slane %v1410_v50, 5  ;;  %v1399_v63 = vsel %vm2662_vm4, %v1394_v56, %v1398_v54 }
  0x76   : > { %v1346_v16 = vrot.slane %v1345_v7, 4  ;;  %v1365_v44 = vsel %vm2662_vm4, %v1360_v34, %v1364_v12  ;;  %v1416_v59 = vrot.slane %v1414_v51, 4  ;;  %v1422_v7 = vrot.slane %v1420_v3, 5 }
  0x78   : > { %2350 = vmatmul.mubr.msk.bf16.gmra.mrb[40].mxu1 %vm300_vm1, %v2078_v8  ;;  %v1348_v8 = vshll.u32 %v2065_v61, 16  ;;  %v2464_v61 = vld [vmem:[%s2644_s7 + $0x6c] sm:$0xff]   ;;  %v1417_v2 = vor.u32 %v1416_v59, %v1412_v58  ;;  %s2469_s7 = sshll.u32 %s2547_s6, 4  ;;  %s2470_s7 = int_to_ptr.vmem [resolvable:$false] %s2469_s7 }
  0x79   : > { %2353 = vmatprep.mubr.msk.bf16.mxu1 %vm2546_vm0, %v2545_v1  ;;  %s2471_s8 = scalar_lea.vmem %s2470_s7, 2304  ;;  %p2472_p1 = scmp.lt.s32.totalorder %s3003_s28, %s2470_s7 }
  0x7a   : > { %v1350_v17 = vrot.slane %v1348_v8, 5  ;;  %v1418_v6 = vrot.slane %v1417_v2, 4  ;;  %p2473_p2 = scmp.lt.s32.totalorder %s2471_s8, %s2465_s5 }
  0x7c   : > { %2320 = vmatmul.mubr.msk.bf16.gmra.mrb[48].mxu0 %vm300_vm1, %v2459_v21  ;;  %v1380_v21 = vshll.u32 %v2069_v14, 16  ;;  %v1351_v27 = vsel %vm2662_vm4, %v1346_v16, %v1350_v17  ;;  %p2474_p3 = por %p2473_p2, %p2472_p1 }
  0x7d   : > { %2323 = vmatprep.mubr.msk.bf16.mxu0 %vm2546_vm0, %v2545_v1  ;;  %v2082_v33 = vcombine.low %v1341_v26, %v1351_v27 }
  0x7e   : > { %p2475_p5 = pnand %p2474_p3, %p2468_p0 }
  0x80   : > { %2354 = vmatmul.mubr.msk.bf16.gmra.mrb[44].mxu1 %vm300_vm1, %v2079_v32  ;;  %v1382_v32 = vrot.slane %v1380_v21, 5 }
  0x81   : > { %2357 = vmatprep.mubr.msk.bf16.mxu1 %vm2546_vm0, %v2545_v1 }
  0x84   : > { %2324 = vmatmul.mubr.msk.bf16.gmra.mrb[52].mxu0 %vm300_vm1, %v2460_v42  ;;  %v1383_v42 = vor.u32 %v1382_v32, %v1379_v31 }
  0x85   : > { %2327 = vmatprep.mubr.msk.bf16.mxu0 %vm2546_vm0, %v2545_v1 }
  0x86   : > { %v1384_v53 = vrot.slane %v1383_v42, 4 }
  0x88   : > { %2358 = vmatmul.mubr.msk.bf16.gmra.mrb[48].mxu1 %vm300_vm1, %v2080_v52  ;;  %v2083_v52 = vcombine.low %v1365_v44, %v1375_v45  ;;  %v1389_v62 = vsel %vm2662_vm4, %v1384_v53, %v1388_v38 }
  0x89   : > { %2361 = vmatprep.mubr.msk.bf16.mxu1 %vm2546_vm0, %v2545_v1  ;;  %v2084_v4 = vcombine.low %v1389_v62, %v1399_v63 }
  0x8c   : > { %2328 = vmatmul.mubr.msk.bf16.gmra.mrb[56].mxu0 %vm300_vm1, %v2461_v0  ;;  %v1407_v0 = vor.u32 %v1406_v57, %v1403_v55 }
  0x8d   : > { %2331 = vmatprep.mubr.msk.bf16.mxu0 %vm2546_vm0, %v2545_v1 }
  0x8e   : > { %v1408_v5 = vrot.slane %v1407_v0, 4 }
  0x90   : > { %2362 = vmatmul.mubr.msk.bf16.gmra.mrb[52].mxu1 %vm300_vm1, %v2081_v9  ;;  %v1413_v8 = vsel %vm2662_vm4, %v1408_v5, %v1412_v58  ;;  %v1423_v9 = vsel %vm2662_vm4, %v1418_v6, %v1422_v7 }
  0x91   : > { %2365 = vmatprep.mubr.msk.bf16.mxu1 %vm2546_vm0, %v2545_v1  ;;  %v2085_v10 = vcombine.low %v1413_v8, %v1423_v9 }
  0x94   : > { %2332 = vmatmul.mubr.msk.bf16.gmra.mrb[60].mxu0 %vm300_vm1, %v2462_v22 }
  0x95   : > { %2335 = vmatprep.mubr.msk.bf16.mxu0 %vm2546_vm0, %v2545_v1 }
  0x98   : > { %2366 = vmatmul.mubr.msk.bf16.gmra.mrb[56].mxu1 %vm300_vm1, %v2082_v33 }
  0x99   : > { %2369 = vmatprep.mubr.msk.bf16.mxu1 %vm2546_vm0, %v2545_v1 }
  0x9c   : > { %2336 = vmatmul.mubr.msk.bf16.gmra.mrb[64].mxu0 %vm300_vm1, %v2463_v43 }
  0x9d   : > { %2339 = vmatprep.mubr.msk.bf16.mxu0 %vm2546_vm0, %v2545_v1 }
  0xa0   : > { %2370 = vmatmul.mubr.msk.bf16.gmra.mrb[60].mxu1 %vm300_vm1, %v2083_v52 }
  0xa1   : > { %2373 = vmatprep.mubr.msk.bf16.mxu1 %vm2546_vm0, %v2545_v1 }
  0xa4   : > { %2340 = vmatmul.mubr.msk.bf16.gmra.mrb[68].mxu0 %vm300_vm1, %v2464_v61 }
  0xa8   : > { %2374 = vmatmul.mubr.msk.bf16.gmra.mrb[64].mxu1 %vm300_vm1, %v2084_v4 }
  0xa9   : > { %2377 = vmatprep.mubr.msk.bf16.mxu1 %vm2546_vm0, %v2545_v1 }
  0xb0   : > { %2378 = vmatmul.mubr.msk.bf16.gmra.mrb[68].mxu1 %vm300_vm1, %v2085_v10 }
  0xef   : > { %v362_v11 = vpop.f32.mrb[0].mxu0 }
  0xf0   : > { %v2233_v12 = vpop.f32.mrb[1].mxu0 }
  0xf1   : > { %v365_v13 = vpop.f32.mrb[2].mxu0 }
  0xf2   : > { %v2234_v14 = vpop.f32.mrb[3].mxu0 }
  0xf7   : > { %v370_v15 = vpop.f32.mrb[4].mxu0 }
  0xf8   : > { %v2237_v16 = vpop.f32.mrb[5].mxu0 }
  0xf9   : > { %v373_v17 = vpop.f32.mrb[6].mxu0 }
  0xfa   : > { %v2238_v18 = vpop.f32.mrb[7].mxu0 }
  0xfb   : > { %v794_v19 = vpop.f32.mrb[0].mxu1 }
  0xfc   : > { %v2906_v20 = vadd.f32 %v794_v19, %v362_v11  ;;  %v2271_v1 = vpop.f32.mrb[1].mxu1 }
  0xfd   : > { %v797_v21 = vpop.f32.mrb[2].mxu1 }
  0xfe   : > { %v2908_v22 = vadd.f32 %v797_v21, %v365_v13  ;;  %v2272_v29 = vpop.f32.mrb[3].mxu1 }
  0xff   : > { %v378_v23 = vpop.f32.mrb[8].mxu0 }
 0x100   : > { %v2241_v24 = vpop.f32.mrb[9].mxu0 }
 0x101   : > { %v381_v25 = vpop.f32.mrb[10].mxu0 }
 0x102   : > { %v2242_v26 = vpop.f32.mrb[11].mxu0 }
 0x103   : > { %v802_v27 = vpop.f32.mrb[4].mxu1 }
 0x104   : > { %v2910_v28 = vadd.f32 %v802_v27, %v370_v15  ;;  %v2275_v30 = vpop.f32.mrb[5].mxu1 }
 0x105   : > { %v805_v31 = vpop.f32.mrb[6].mxu1 }
 0x106   : > { %v2912_v32 = vadd.f32 %v805_v31, %v373_v17  ;;  %v2276_v33 = vpop.f32.mrb[7].mxu1 }
 0x107   : > { %v386_v34 = vpop.f32.mrb[12].mxu0 }
 0x108   : > { %v2245_v35 = vpop.f32.mrb[13].mxu0 }
 0x109   : > { %v389_v36 = vpop.f32.mrb[14].mxu0 }
 0x10a   : > { %v2246_v37 = vpop.f32.mrb[15].mxu0 }
 0x10b   : > { %v810_v38 = vpop.f32.mrb[8].mxu1 }
 0x10c   : > { %v2914_v39 = vadd.f32 %v810_v38, %v378_v23  ;;  %v2279_v40 = vpop.f32.mrb[9].mxu1 }
 0x10d   : > { %v813_v41 = vpop.f32.mrb[10].mxu1 }
 0x10e   : > { %v2916_v42 = vadd.f32 %v813_v41, %v381_v25  ;;  %v2280_v43 = vpop.f32.mrb[11].mxu1 }
 0x10f   : > { %v394_v44 = vpop.f32.mrb[16].mxu0 }
 0x110   : > { %v2249_v45 = vpop.f32.mrb[17].mxu0 }
 0x111   : > { %v397_v46 = vpop.f32.mrb[18].mxu0 }
 0x112   : > { %v2250_v47 = vpop.f32.mrb[19].mxu0 }
 0x113   : > { %v818_v48 = vpop.f32.mrb[12].mxu1 }
 0x114   : > { %v2918_v49 = vadd.f32 %v818_v48, %v386_v34  ;;  %v2283_v50 = vpop.f32.mrb[13].mxu1 }
 0x115   : > { %v821_v51 = vpop.f32.mrb[14].mxu1 }
 0x116   : > { %v2920_v52 = vadd.f32 %v821_v51, %v389_v36  ;;  %v2284_v53 = vpop.f32.mrb[15].mxu1 }
 0x117   : > { %v402_v54 = vpop.f32.mrb[20].mxu0 }
 0x118   : > { %v2253_v55 = vpop.f32.mrb[21].mxu0 }
 0x119   : > { %v405_v56 = vpop.f32.mrb[22].mxu0  ;;  %v2949_v55 = vld [vmem:[%s3056_s2] ss:$0 sm:$0xff] }
 0x11a   : > { %v2254_v57 = vpop.f32.mrb[23].mxu0 }
 0x11b   : > { %v826_v58 = vpop.f32.mrb[16].mxu1 }
 0x11c   : > { %v2922_v59 = vadd.f32 %v826_v58, %v394_v44  ;;  %v2287_v60 = vpop.f32.mrb[17].mxu1 }
 0x11d   : > { %v829_v61 = vpop.f32.mrb[18].mxu1 }
 0x11e   : > { %v2924_v62 = vadd.f32 %v829_v61, %v397_v46  ;;  %v2288_v63 = vpop.f32.mrb[19].mxu1 }
 0x11f   : > { %v410_v0 = vpop.f32.mrb[24].mxu0 }
 0x120   : > { %v2257_v2 = vpop.f32.mrb[25].mxu0 }
 0x121   : > { %v413_v3 = vpop.f32.mrb[26].mxu0 }
 0x122   : > { %v2258_v4 = vpop.f32.mrb[27].mxu0 }
 0x123   : > { %v834_v5 = vpop.f32.mrb[20].mxu1 }
 0x124   : > { %v2926_v6 = vadd.f32 %v834_v5, %v402_v54  ;;  %v2291_v7 = vpop.f32.mrb[21].mxu1 }
 0x125   : > { %v837_v8 = vpop.f32.mrb[22].mxu1 }
 0x126   : > { %v2928_v9 = vadd.f32 %v837_v8, %v405_v56  ;;  %v2292_v10 = vpop.f32.mrb[23].mxu1 }
 0x127   : > { %v418_v11 = vpop.f32.mrb[28].mxu0 }
 0x128   : > { %v2261_v12 = vpop.f32.mrb[29].mxu0 }
 0x129   : > { %v421_v13 = vpop.f32.mrb[30].mxu0 }
 0x12a   : > { %v2262_v14 = vpop.f32.mrb[31].mxu0 }
 0x12b   : > { %v842_v15 = vpop.f32.mrb[24].mxu1 }
 0x12c   : > { %v2930_v16 = vadd.f32 %v842_v15, %v410_v0  ;;  %v2295_v17 = vpop.f32.mrb[25].mxu1 }
 0x12d   : > { %v845_v18 = vpop.f32.mrb[26].mxu1 }
 0x12e   : > { %v2932_v19 = vadd.f32 %v845_v18, %v413_v3  ;;  %v2296_v1 = vpop.f32.mrb[27].mxu1 }
 0x12f   : > { %v426_v21 = vpop.f32.mrb[32].mxu0 }
 0x130   : > { %v2265_v29 = vpop.f32.mrb[33].mxu0 }
 0x131   : > { %v429_v23 = vpop.f32.mrb[34].mxu0 }
 0x132   : > { %v2266_v24 = vpop.f32.mrb[35].mxu0 }
 0x133   : > { %v850_v25 = vpop.f32.mrb[28].mxu1 }
 0x134   : > { %v2934_v26 = vadd.f32 %v850_v25, %v418_v11  ;;  %v2299_v27 = vpop.f32.mrb[29].mxu1 }
 0x135   : > { %v853_v30 = vpop.f32.mrb[30].mxu1 }
 0x136   : > { %v2936_v31 = vadd.f32 %v853_v30, %v421_v13  ;;  %v2300_v33 = vpop.f32.mrb[31].mxu1 }
 0x137   : > { %v1056_v34 = vpop.f32.mrb[36].mxu0 }
 0x138   : > { %v1145_v35 = vadd.f32 %v1056_v34, %v2906_v20  ;;  %v2309_v36 = vpop.f32.mrb[37].mxu0 }
 0x139   : > { %v1059_v37 = vpop.f32.mrb[38].mxu0 }
 0x13a   : > { %v1146_v38 = vadd.f32 %v1059_v37, %v2908_v22  ;;  %v2310_v40 = vpop.f32.mrb[39].mxu0 }
 0x13b   : > { %v858_v41 = vpop.f32.mrb[32].mxu1 }
 0x13c   : > { %v2940_v43 = vadd.f32 %v858_v41, %v426_v21  ;;  %v2303_v44 = vpop.f32.mrb[33].mxu1 }
 0x13d   : > { %v861_v45 = vpop.f32.mrb[34].mxu1 }
 0x13e   : > { %v2942_v46 = vadd.f32 %v861_v45, %v429_v23  ;;  %v2304_v47 = vpop.f32.mrb[35].mxu1 }
 0x13f   : > { %v1064_v48 = vpop.f32.mrb[40].mxu0 }
 0x140   : > { %v1147_v50 = vadd.f32 %v1064_v48, %v2910_v28  ;;  %v2313_v51 = vpop.f32.mrb[41].mxu0 }
 0x141   : > { %v1067_v20 = vpop.f32.mrb[42].mxu0 }
 0x142   : > { %v1148_v53 = vadd.f32 %v1067_v20, %v2912_v32  ;;  %v2314_v54 = vpop.f32.mrb[43].mxu0 }
 0x143   : > { %v1521_v22 = vpop.f32.mrb[36].mxu1 }
 0x144   : > { %v1610_v56 = vadd.f32 %v1521_v22, %v1145_v35  ;;  %v2347_v57 = vpop.f32.mrb[37].mxu1 }
 0x145   : > { %v1524_v58 = vpop.f32.mrb[38].mxu1 }
 0x146   : > { %v1671_v60 = vadd.f32 %v2949_v55, %v1610_v56  ;;  %v1611_v61 = vadd.f32 %v1524_v58, %v1146_v38  ;;  %v2348_v28 = vpop.f32.mrb[39].mxu1 }
 0x147   : > { %v1072_v63 = vpop.f32.mrb[44].mxu0 }
 0x148   : > { %v1707_v0 = vmul.f32 0.2, %v1671_v60  ;;  %v1672_v32 = vadd.f32 %v2949_v55, %v1611_v61  ;;  %v1149_v2 = vadd.f32 %v1072_v63, %v2914_v39  ;;  %v2317_v3 = vpop.f32.mrb[45].mxu0  ;;  %vm1689_vm5 = vcmp.ge.f32.partialorder %v1671_v60, 0.0 }
 0x149   : > { %v1075_v4 = vpop.f32.mrb[46].mxu0 }
 0x14a   : > { %vm1690_vm6 = vcmp.ge.f32.partialorder %v1672_v32, 0.0  ;;  %v1708_v5 = vmul.f32 0.2, %v1672_v32  ;;  %v1150_v7 = vadd.f32 %v1075_v4, %v2916_v42  ;;  %v2318_v8 = vpop.f32.mrb[47].mxu0  ;;  %v1725_v11 = vsel %vm1689_vm5, %v1671_v60, %v1707_v0 }
 0x14b   : > { %v1529_v10 = vpop.f32.mrb[40].mxu1 }
 0x14c   : > { %v1726_v12 = vsel %vm1690_vm6, %v1672_v32, %v1708_v5  ;;  %v1612_v13 = vadd.f32 %v1529_v10, %v1147_v50  ;;  %v2351_v14 = vpop.f32.mrb[41].mxu1 }
 0x14d   : > { %v2139_v15 = vpack.c.bf16 %v1726_v12, %v1725_v11  ;;  %v1532_v17 = vpop.f32.mrb[42].mxu1 }
 0x14e   : > { %v1673_v18 = vadd.f32 %v2949_v55, %v1612_v13  ;;  %v1613_v1 = vadd.f32 %v1532_v17, %v1148_v53  ;;  %v2352_v21 = vpop.f32.mrb[43].mxu1 }
 0x14f   : > { %2140 = vst [vmem:[%s2959_s26] sm:$0xff] %v2139_v15   ;;  %v1080_v39 = vpop.f32.mrb[48].mxu0 }
 0x150   : > { %v1709_v29 = vmul.f32 0.2, %v1673_v18  ;;  %v1674_v42 = vadd.f32 %v2949_v55, %v1613_v1  ;;  %v1151_v23 = vadd.f32 %v1080_v39, %v2918_v49  ;;  %v2321_v24 = vpop.f32.mrb[49].mxu0  ;;  %vm1691_vm7 = vcmp.ge.f32.partialorder %v1673_v18, 0.0 }
 0x151   : > { %v1083_v25 = vpop.f32.mrb[50].mxu0 }
 0x152   : > { %vm1692_vm8 = vcmp.ge.f32.partialorder %v1674_v42, 0.0  ;;  %v1710_v27 = vmul.f32 0.2, %v1674_v42  ;;  %v1152_v30 = vadd.f32 %v1083_v25, %v2920_v52  ;;  %v2322_v33 = vpop.f32.mrb[51].mxu0  ;;  %v1727_v35 = vsel %vm1691_vm7, %v1673_v18, %v1709_v29 }
 0x153   : > { %v1537_v34 = vpop.f32.mrb[44].mxu1 }
 0x154   : > { %v1728_v36 = vsel %vm1692_vm8, %v1674_v42, %v1710_v27  ;;  %v1614_v37 = vadd.f32 %v1537_v34, %v1149_v2  ;;  %v2355_v38 = vpop.f32.mrb[45].mxu1 }
 0x155   : > { %v2144_v40 = vpack.c.bf16 %v1728_v36, %v1727_v35  ;;  %v1540_v41 = vpop.f32.mrb[46].mxu1 }
 0x156   : > { %v1675_v44 = vadd.f32 %v2949_v55, %v1614_v37  ;;  %v1615_v45 = vadd.f32 %v1540_v41, %v1150_v7  ;;  %v2356_v49 = vpop.f32.mrb[47].mxu1 }
 0x157   : > { %2181 = vst [vmem:[%s2959_s26 + $0x8] sm:$0xff] %v2144_v40   ;;  %v1088_v47 = vpop.f32.mrb[52].mxu0 }
 0x158   : > { %v1711_v48 = vmul.f32 0.2, %v1675_v44  ;;  %v1676_v50 = vadd.f32 %v2949_v55, %v1615_v45  ;;  %v1153_v51 = vadd.f32 %v1088_v47, %v2922_v59  ;;  %v2325_v52 = vpop.f32.mrb[53].mxu0  ;;  %vm1693_vm9 = vcmp.ge.f32.partialorder %v1675_v44, 0.0 }
 0x159   : > { %v1091_v20 = vpop.f32.mrb[54].mxu0 }
 0x15a   : > { %vm1694_vm10 = vcmp.ge.f32.partialorder %v1676_v50, 0.0  ;;  %v1712_v53 = vmul.f32 0.2, %v1676_v50  ;;  %v1154_v54 = vadd.f32 %v1091_v20, %v2924_v62  ;;  %v2326_v22 = vpop.f32.mrb[55].mxu0  ;;  %v1729_v57 = vsel %vm1693_vm9, %v1675_v44, %v1711_v48 }
 0x15b   : > { %v1545_v56 = vpop.f32.mrb[48].mxu1 }
 0x15c   : > { %v1730_v58 = vsel %vm1694_vm10, %v1676_v50, %v1712_v53  ;;  %v1616_v60 = vadd.f32 %v1545_v56, %v1151_v23  ;;  %v2359_v61 = vpop.f32.mrb[49].mxu1 }
 0x15d   : > { %v2149_v28 = vpack.c.bf16 %v1730_v58, %v1729_v57  ;;  %v1548_v63 = vpop.f32.mrb[50].mxu1 }
 0x15e   : > { %v1677_v0 = vadd.f32 %v2949_v55, %v1616_v60  ;;  %v1617_v32 = vadd.f32 %v1548_v63, %v1152_v30  ;;  %v2360_v59 = vpop.f32.mrb[51].mxu1 }
 0x15f   : > { %2182 = vst [vmem:[%s2959_s26 + $0x10] sm:$0xff] %v2149_v28   ;;  %v1096_v2 = vpop.f32.mrb[56].mxu0 }
 0x160   : > { %v1713_v3 = vmul.f32 0.2, %v1677_v0  ;;  %v1678_v4 = vadd.f32 %v2949_v55, %v1617_v32  ;;  %v1155_v5 = vadd.f32 %v1096_v2, %v2926_v6  ;;  %v2329_v62 = vpop.f32.mrb[57].mxu0  ;;  %vm1695_vm11 = vcmp.ge.f32.partialorder %v1677_v0, 0.0 }
 0x161   : > { %v1099_v7 = vpop.f32.mrb[58].mxu0 }
 0x162   : > { %vm1696_vm12 = vcmp.ge.f32.partialorder %v1678_v4, 0.0  ;;  %v1714_v8 = vmul.f32 0.2, %v1678_v4  ;;  %v1156_v10 = vadd.f32 %v1099_v7, %v2928_v9  ;;  %v2330_v11 = vpop.f32.mrb[59].mxu0  ;;  %v1731_v13 = vsel %vm1695_vm11, %v1677_v0, %v1713_v3 }
 0x163   : > { %v1553_v12 = vpop.f32.mrb[52].mxu1 }
 0x164   : > { %v1732_v14 = vsel %vm1696_vm12, %v1678_v4, %v1714_v8  ;;  %v1618_v15 = vadd.f32 %v1553_v12, %v1153_v51  ;;  %v2363_v17 = vpop.f32.mrb[53].mxu1 }
 0x165   : > { %v2154_v18 = vpack.c.bf16 %v1732_v14, %v1731_v13  ;;  %v1556_v1 = vpop.f32.mrb[54].mxu1 }
 0x166   : > { %v1679_v21 = vadd.f32 %v2949_v55, %v1618_v15  ;;  %v1619_v39 = vadd.f32 %v1556_v1, %v1154_v54  ;;  %v2364_v6 = vpop.f32.mrb[55].mxu1 }
 0x167   : > { %2183 = vst [vmem:[%s2959_s26 + $0x18] sm:$0xff] %v2154_v18   ;;  %v1104_v29 = vpop.f32.mrb[60].mxu0 }
 0x168   : > { %v1715_v42 = vmul.f32 0.2, %v1679_v21  ;;  %v1680_v23 = vadd.f32 %v2949_v55, %v1619_v39  ;;  %v1157_v24 = vadd.f32 %v1104_v29, %v2930_v16  ;;  %v2333_v9 = vpop.f32.mrb[61].mxu0  ;;  %vm1697_vm13 = vcmp.ge.f32.partialorder %v1679_v21, 0.0 }
 0x169   : > { %v1107_v25 = vpop.f32.mrb[62].mxu0 }
 0x16a   : > { %vm1698_vm14 = vcmp.ge.f32.partialorder %v1680_v23, 0.0  ;;  %v1716_v27 = vmul.f32 0.2, %v1680_v23  ;;  %v1158_v30 = vadd.f32 %v1107_v25, %v2932_v19  ;;  %v2334_v33 = vpop.f32.mrb[63].mxu0  ;;  %v1733_v35 = vsel %vm1697_vm13, %v1679_v21, %v1715_v42 }
 0x16b   : > { %v1561_v34 = vpop.f32.mrb[56].mxu1 }
 0x16c   : > { %v1734_v36 = vsel %vm1698_vm14, %v1680_v23, %v1716_v27  ;;  %v1620_v37 = vadd.f32 %v1561_v34, %v1155_v5  ;;  %v2367_v38 = vpop.f32.mrb[57].mxu1 }
 0x16d   : > { %v2159_v40 = vpack.c.bf16 %v1734_v36, %v1733_v35  ;;  %v1564_v41 = vpop.f32.mrb[58].mxu1 }
 0x16e   : > { %v1681_v44 = vadd.f32 %v2949_v55, %v1620_v37  ;;  %v1621_v45 = vadd.f32 %v1564_v41, %v1156_v10  ;;  %v2368_v16 = vpop.f32.mrb[59].mxu1 }
 0x16f   : > { %2184 = vst [vmem:[%s2959_s26 + $0x20] sm:$0xff] %v2159_v40   ;;  %v1112_v49 = vpop.f32.mrb[64].mxu0 }
 0x170   : > { %v1717_v47 = vmul.f32 0.2, %v1681_v44  ;;  %v1682_v48 = vadd.f32 %v2949_v55, %v1621_v45  ;;  %v1159_v50 = vadd.f32 %v1112_v49, %v2934_v26  ;;  %v2337_v19 = vpop.f32.mrb[65].mxu0  ;;  %vm1699_vm15 = vcmp.ge.f32.partialorder %v1681_v44, 0.0 }
 0x171   : > { %v1115_v51 = vpop.f32.mrb[66].mxu0 }
 0x172   : > { %vm1700_vm0 = vcmp.ge.f32.partialorder %v1682_v48, 0.0  ;;  %v1718_v52 = vmul.f32 0.2, %v1682_v48  ;;  %v1160_v20 = vadd.f32 %v1115_v51, %v2936_v31  ;;  %v2338_v53 = vpop.f32.mrb[67].mxu0  ;;  %v1735_v22 = vsel %vm1699_vm15, %v1681_v44, %v1717_v47 }
 0x173   : > { %v1569_v54 = vpop.f32.mrb[60].mxu1 }
 0x174   : > { %v1736_v56 = vsel %vm1700_vm0, %v1682_v48, %v1718_v52  ;;  %v1622_v57 = vadd.f32 %v1569_v54, %v1157_v24  ;;  %v2371_v58 = vpop.f32.mrb[61].mxu1 }
 0x175   : > { %v2164_v60 = vpack.c.bf16 %v1736_v56, %v1735_v22  ;;  %v1572_v61 = vpop.f32.mrb[62].mxu1 }
 0x176   : > { %v1683_v28 = vadd.f32 %v2949_v55, %v1622_v57  ;;  %v1623_v63 = vadd.f32 %v1572_v61, %v1158_v30  ;;  %v2372_v26 = vpop.f32.mrb[63].mxu1 }
 0x177   : > { %2185 = vst [vmem:[%s2959_s26 + $0x28] sm:$0xff] %v2164_v60   ;;  %v1120_v0 = vpop.f32.mrb[68].mxu0 }
 0x178   : > { %v1719_v32 = vmul.f32 0.2, %v1683_v28  ;;  %v1684_v59 = vadd.f32 %v2949_v55, %v1623_v63  ;;  %v1161_v2 = vadd.f32 %v1120_v0, %v2940_v43  ;;  %v2341_v31 = vpop.f32.mrb[69].mxu0  ;;  %vm1701_vm1 = vcmp.ge.f32.partialorder %v1683_v28, 0.0 }
 0x179   : > { %v1123_v3 = vpop.f32.mrb[70].mxu0 }
 0x17a   : > { %vm1702_vm2 = vcmp.ge.f32.partialorder %v1684_v59, 0.0  ;;  %v1720_v4 = vmul.f32 0.2, %v1684_v59  ;;  %v1162_v5 = vadd.f32 %v1123_v3, %v2942_v46  ;;  %v2342_v62 = vpop.f32.mrb[71].mxu0  ;;  %v1737_v8 = vsel %vm1701_vm1, %v1683_v28, %v1719_v32 }
 0x17b   : > { %v1577_v7 = vpop.f32.mrb[64].mxu1 }
 0x17c   : > { %v1738_v10 = vsel %vm1702_vm2, %v1684_v59, %v1720_v4  ;;  %v1624_v11 = vadd.f32 %v1577_v7, %v1159_v50  ;;  %v2375_v12 = vpop.f32.mrb[65].mxu1 }
 0x17d   : > { %v2169_v13 = vpack.c.bf16 %v1738_v10, %v1737_v8  ;;  %v1580_v14 = vpop.f32.mrb[66].mxu1 }
 0x17e   : > { %v1685_v15 = vadd.f32 %v2949_v55, %v1624_v11  ;;  %v1625_v17 = vadd.f32 %v1580_v14, %v1160_v20  ;;  %v2376_v43 = vpop.f32.mrb[67].mxu1 }
 0x17f   : > { %2186 = vst [vmem:[%s2959_s26 + $0x30] sm:$0xff] %v2169_v13  }
 0x180   : > { %v1721_v18 = vmul.f32 0.2, %v1685_v15  ;;  %v1686_v1 = vadd.f32 %v2949_v55, %v1625_v17  ;;  %vm1703_vm3 = vcmp.ge.f32.partialorder %v1685_v15, 0.0 }
 0x182   : > { %vm1704_vm4 = vcmp.ge.f32.partialorder %v1686_v1, 0.0  ;;  %v1722_v46 = vmul.f32 0.2, %v1686_v1  ;;  %v1739_v39 = vsel %vm1703_vm3, %v1685_v15, %v1721_v18 }
 0x183   : > { %v1585_v21 = vpop.f32.mrb[68].mxu1 }
 0x184   : > { %v1740_v6 = vsel %vm1704_vm4, %v1686_v1, %v1722_v46  ;;  %v1626_v29 = vadd.f32 %v1585_v21, %v1161_v2  ;;  %v2379_v42 = vpop.f32.mrb[69].mxu1 }
 0x185   : > { %v2174_v23 = vpack.c.bf16 %v1740_v6, %v1739_v39  ;;  %v1588_v24 = vpop.f32.mrb[70].mxu1 }
 0x186   : > { %v1687_v9 = vadd.f32 %v2949_v55, %v1626_v29  ;;  %v1627_v25 = vadd.f32 %v1588_v24, %v1162_v5  ;;  %v2380_v27 = vpop.f32.mrb[71].mxu1 }
 0x187   : > { %2187 = vst [vmem:[%s2959_s26 + $0x38] sm:$0xff] %v2174_v23  }
 0x188   : > { %v1723_v30 = vmul.f32 0.2, %v1687_v9  ;;  %v1688_v33 = vadd.f32 %v2949_v55, %v1627_v25  ;;  %vm1705_vm5 = vcmp.ge.f32.partialorder %v1687_v9, 0.0 }
 0x18a   : > { %vm1706_vm6 = vcmp.ge.f32.partialorder %v1688_v33, 0.0  ;;  %v1724_v34 = vmul.f32 0.2, %v1688_v33  ;;  %v1741_v35 = vsel %vm1705_vm5, %v1687_v9, %v1723_v30 }
 0x18c   : > { %v1742_v36 = vsel %vm1706_vm6, %v1688_v33, %v1724_v34 }
 0x18d   : > { %v2179_v37 = vpack.c.bf16 %v1742_v36, %v1741_v35 }
 0x18f   : > { %2188 = vst [vmem:[%s2959_s26 + $0x40] sm:$0xff] %v2179_v37  }
 0x190   : > { %2478 = shalt.err (!%p2475_p5)
}
 0x191   : > { %s2479_s9 = scalar_lea.hbm %s3001_s4, 1152  ;;  %s2483_s18 = scalar_lea.hbm %s3057_s3, 2304 }
 0x192   : > { %p2480_p6 = scmp.ne.s32.totalorder %s3001_s4, %s2479_s9  ;;  %p2484_p10 = scmp.lt.u32.totalorder %s3001_s4, %s3057_s3 }
 0x193   : > { %p2485_p11 = scmp.lt.u32.totalorder %s2483_s18, %s2479_s9  ;;  %p2487_p13 = scmp.lt.u32.totalorder %s2479_s9, %s3001_s4 }
 0x194   : > { %p2481_p7 = pnand %p2480_p6, %p2610_p4 }
 0x195   : > { %p2486_p12 = por %p2485_p11, %p2484_p10 }
 0x196   : > { %p2482_p9 = pneg %p2481_p7 }
 0x197   : > { %p2488_p0 = por %p2487_p13, %p2486_p12 }
 0x199   : > { %p2489_p1 = pnand %p2488_p0, %p2482_p9 }
 0x19b   : > { %2492 = shalt.err (!%p2489_p1)
}
 0x19c   : > { %s2548_s23 = smov 64   ;;  %s2549_s26 = smov 4  }
 0x19d   : > { %2384 = dma.vmem_to_hbm [thread:$0]  (%p2610_p4), %s3003_s28, 1152, %s3001_s4, %s3008_s15, %s2548_s23, %s2548_s23, %s2549_s26  }
 0x19e PF: > { %p2390_p2 = scmp.ge.s32.totalorder %s2543_s17, 2  ;;  %s1866_s27 = sand.u32 1, %s2523_s12  }
 0x19f   : > { %s1867_s29 = scalar_lea.sflag [#allocation4], %s1866_s27 }
 0x1a0   : > { %p2387_p3 = pnand %p2390_p2, %p2617_p8 }
 0x1a2   : > { %2518 = dma.done.wait (!%p2387_p3), %s1867_s29, 1152  }
 0x1a3   : > { %2520 = vsyncadd (!%p2387_p3), %s1867_s29, 4294966144  ;;  %s16_s17 = sadd.s32 1, %s2543_s17   ;;  %s3062_s12 = smov %s2527_s13 }
 0x1a4   : > { %p13_p5 = scmp.ge.s32.totalorder %s16_s17, 4   ;;  %s3063_s13 = smov %s2531_s14 }
 0x1a5   : > { %s3064_s14 = smov %s2623_s25  ;;  %s3065_s15 = smov %s2539_s16 }
 0x1a6   : > { %s3066_s16 = smov %s3068_s20  ;;  %15 = sbr.rel (!%p13_p5) target bundleno = 4 (0x4), region = 78 }
 0x1ad   :  { %1872 = vsyncpa [#allocation4], 1 }
 0x1ae   :  { %1874 = vsyncpa [#allocation4 + $0x1], 1 }

</bundles_post_ra>
